<compile_context>
chip_gen: v7x
topology: tpu7x:2x2x1
jax: 0.10.0
libtpu: 0.0.40
codegen_flags: <defaults>
</compile_context>

<pallas_src>
import jax
import jax.numpy as jnp
import numpy as np
from jax import lax
from jax.experimental import pallas as pl
from jax.experimental.pallas import tpu as pltpu


# ----------------------------------------------------------------------------
# Fused Pallas kernel
# ----------------------------------------------------------------------------
def _encoder_kernel(x_ref, w1x_ref, wrec_ref, bias_ref, whead_ref, eps_ref,
                    out_ref):
    """Fused 2-layer LSTM encoder forward; whole working set resident in VMEM.

    x_ref     : (T*B, F)   time-major, flattened inputs
    w1x_ref   : (F, 4H)    layer-1 W_ih^T
    wrec_ref  : (3H, 4H)   [W_hh1^T ; W_ih2^T ; W_hh2^T] stacked on sublanes
    bias_ref  : (3, 4H)    row0 = b_ih1+b_hh1, row1 = b_ih2+b_hh2,
                           row2 = [b_mean | b_logvar | 0...]
    whead_ref : (H, 2L)    [W_mean^T | W_logvar^T] stacked on lanes
    eps_ref   : (B, L)     standard-normal noise for reparametrization
    out_ref   : (B, 3L)    [z_sample | z_mean | z_logvar]
    """
    TB, F = x_ref.shape
    H = wrec_ref.shape[0] // 3
    G = wrec_ref.shape[1]                       # 4H
    L = whead_ref.shape[1] // 2
    B = eps_ref.shape[0]
    T = TB // B

    # --- hoisted one-time slab loads / static slices (zero per-step cost) ---
    wrec = wrec_ref[...]
    w1h = wrec[0 * H:1 * H, :]
    w2x = wrec[1 * H:2 * H, :]
    w2h = wrec[2 * H:3 * H, :]
    b1 = bias_ref[0:1, :]
    b2 = bias_ref[1:2, :]
    b_heads = bias_ref[2:3, 0:2 * L]            # [b_mean | b_logvar]

    # Layer-1 input projection for ALL timesteps in one MXU call (K=F amortized
    # over the whole sequence); kept time-major so per-step access is a
    # contiguous sublane slice.
    xw1 = jnp.dot(x_ref[...], w1x_ref[...],
                  preferred_element_type=jnp.float32) + b1      # (T*B, 4H)

    def gates_act(gates):
        # One sigmoid + one tanh over the full (B, 4H) vreg (2 EUP pushes),
        # then take PyTorch-ordered [i, f, g, o] lane slices.
        sig = jax.nn.sigmoid(gates)
        tnh = jnp.tanh(gates)
        i_g = sig[:, 0 * H:1 * H]
        f_g = sig[:, 1 * H:2 * H]
        g_g = tnh[:, 2 * H:3 * H]
        o_g = sig[:, 3 * H:4 * H]
        return i_g, f_g, g_g, o_g

    zeros = jnp.zeros((B, H), jnp.float32)
    h1, c1, h2, c2 = zeros, zeros, zeros, zeros

    # T is small and static: fully unrolled straight-line recurrence.
    for t in range(T):
        # ---- layer 1: one K=H MXU pass per step ----
        g1 = xw1[t * B:(t + 1) * B, :] + jnp.dot(
            h1, w1h, preferred_element_type=jnp.float32)
        i1, f1, n1, o1 = gates_act(g1)
        c1 = f1 * c1 + i1 * n1
        h1 = o1 * jnp.tanh(c1)

        # ---- layer 2: two independent K=H MXU passes ----
        g2 = (jnp.dot(h1, w2x, preferred_element_type=jnp.float32)
              + jnp.dot(h2, w2h, preferred_element_type=jnp.float32)
              + b2)
        i2, f2, n2, o2 = gates_act(g2)
        c2 = f2 * c2 + i2 * n2
        h2 = o2 * jnp.tanh(c2)

    # ---- merged mean/logvar head (single K=H dot) + reparametrization ----
    zmv = jnp.dot(h2, whead_ref[...],
                  preferred_element_type=jnp.float32) + b_heads  # (B, 2L)
    z_mean = zmv[:, 0:L]
    z_logvar = zmv[:, L:2 * L]
    z_sample = eps_ref[...] * jnp.exp(0.5 * z_logvar) + z_mean

    # Single lane-concatenated store -> one output DMA.
    out_ref[...] = jnp.concatenate([z_sample, zmv], axis=1).astype(out_ref.dtype)


# ----------------------------------------------------------------------------
# One-time parameter preparation (hoisted out of the forward pass)
# ----------------------------------------------------------------------------
def prepare_params(raw):
    """Transpose / cast / combine / pack parameters once, outside forward."""
    f32 = jnp.float32
    G = raw["w_hh1"].shape[0]                     # 4H
    L = raw["w_mean"].shape[0]

    w1x = jnp.asarray(raw["w_ih1"], f32).T                       # (F, 4H)
    wrec = jnp.concatenate(
        [jnp.asarray(raw["w_hh1"], f32).T,                       # (H, 4H)
         jnp.asarray(raw["w_ih2"], f32).T,                       # (H, 4H)
         jnp.asarray(raw["w_hh2"], f32).T], axis=0)              # -> (3H, 4H)

    b1 = jnp.asarray(raw["b_ih1"] + raw["b_hh1"], f32)           # (4H,)
    b2 = jnp.asarray(raw["b_ih2"] + raw["b_hh2"], f32)           # (4H,)
    b_heads = jnp.concatenate(
        [jnp.asarray(raw["b_mean"], f32),
         jnp.asarray(raw["b_logvar"], f32),
         jnp.zeros((G - 2 * L,), f32)], axis=0)                  # (4H,)
    bias = jnp.stack([b1, b2, b_heads], axis=0)                  # (3, 4H)

    whead = jnp.concatenate(
        [jnp.asarray(raw["w_mean"], f32).T,
         jnp.asarray(raw["w_logvar"], f32).T], axis=1)           # (H, 2L)

    return {"w1x": w1x, "wrec": wrec, "bias": bias, "whead": whead}


# ----------------------------------------------------------------------------
# Forward wrapper: a single grid-less pallas_call, everything in VMEM
# ----------------------------------------------------------------------------
def lstm_encoder_forward(prepped, inputs, eps):
    """inputs: (B, T, input_features) batch-first; eps: (B, latent_dim).

    Returns (z_sample, z_mean, z_logvar).
    """
    B, T, F = inputs.shape
    H = prepped["wrec"].shape[0] // 3
    G = prepped["wrec"].shape[1]
    L = prepped["whead"].shape[1] // 2

    # Time-major, flattened input (one-time ~10 KB transpose in XLA is free).
    x_tm = jnp.transpose(inputs.astype(jnp.float32), (1, 0, 2)).reshape(T * B, F)

    # Advisory cost hint for XLA's scheduler.
    flops = (2 * T * B * F * G            # layer-1 input projection
             + T * 3 * 2 * B * H * G      # 3 recurrent dots per step
             + 2 * B * H * 2 * L          # merged head dot
             + 20 * T * B * G)            # elementwise gate math (rough)
    transcendentals = T * 2 * (2 * B * G + B * H) + B * L
    bytes_accessed = 4 * (T * B * F + F * G + 3 * H * G + 3 * G
                          + H * 2 * L + B * L + B * 3 * L)

    out = pl.pallas_call(
        _encoder_kernel,
        out_shape=jax.ShapeDtypeStruct((B, 3 * L), jnp.float32),
        cost_estimate=pl.CostEstimate(flops=int(flops),
                                      transcendentals=int(transcendentals),
                                      bytes_accessed=int(bytes_accessed)),
    )(x_tm, prepped["w1x"], prepped["wrec"], prepped["bias"],
      prepped["whead"], eps.astype(jnp.float32))

    z_sample = out[:, 0:L]
    z_mean = out[:, L:2 * L]
    z_logvar = out[:, 2 * L:3 * L]
    return z_sample, z_mean, z_logvar


# ----------------------------------------------------------------------------
# Pure-JAX reference (for correctness checking)
# ----------------------------------------------------------------------------
def _lstm_ref(x_btf, w_ih, w_hh, b_ih, b_hh):
    B, T, F = x_btf.shape
    H = w_hh.shape[1]
    wih_t = jnp.transpose(w_ih)
    whh_t = jnp.transpose(w_hh)
    b = b_ih + b_hh

    def step(carry, x_t):
        h, c = carry
        gates = x_t @ wih_t + h @ whh_t + b
        i = jax.nn.sigmoid(gates[:, 0 * H:1 * H])
        f = jax.nn.sigmoid(gates[:, 1 * H:2 * H])
        g = jnp.tanh(gates[:, 2 * H:3 * H])
        o = jax.nn.sigmoid(gates[:, 3 * H:4 * H])
        c = f * c + i * g
        h = o * jnp.tanh(c)
        return (h, c), h

    x_tbf = jnp.transpose(x_btf, (1, 0, 2))
    (h, c), hs = lax.scan(step, (jnp.zeros((B, H)), jnp.zeros((B, H))), x_tbf)
    return jnp.transpose(hs, (1, 0, 2)), h


def _forward_ref(params, inputs, eps):
    h1, _ = _lstm_ref(inputs, params["w_ih1"], params["w_hh1"],
                      params["b_ih1"], params["b_hh1"])
    h1, h1_T = _lstm_ref(h1, params["w_ih2"], params["w_hh2"],
                         params["b_ih2"], params["b_hh2"])
    z_mean = h1_T @ params["w_mean"].T + params["b_mean"]
    z_logvar = h1_T @ params["w_logvar"].T + params["b_logvar"]
    z_sample = eps * jnp.exp(0.5 * z_logvar) + z_mean
    return z_sample, z_mean, z_logvar


# ----------------------------------------------------------------------------
# Main
# ----------------------------------------------------------------------------
if __name__ == "__main__":
    # Module hyperparameters (defaults from __init__).
    input_features = 3 * 53      # 159
    h_features = 32
    latent_dim = 32
    batch, seq_len = 2, 8

    key = jax.random.PRNGKey(0)
    keys = jax.random.split(key, 16)

    def uni(k, shape, fan):
        bound = 1.0 / np.sqrt(fan)
        return jax.random.uniform(k, shape, jnp.float32, -bound, bound)

    H4 = 4 * h_features
    params = {
        # lstm1: input_features -> h_features
        "w_ih1": uni(keys[0], (H4, input_features), h_features),
        "w_hh1": uni(keys[1], (H4, h_features), h_features),
        "b_ih1": uni(keys[2], (H4,), h_features),
        "b_hh1": uni(keys[3], (H4,), h_features),
        # lstm2: h_features -> h_features
        "w_ih2": uni(keys[4], (H4, h_features), h_features),
        "w_hh2": uni(keys[5], (H4, h_features), h_features),
        "b_ih2": uni(keys[6], (H4,), h_features),
        "b_hh2": uni(keys[7], (H4,), h_features),
        # linear heads
        "w_mean": uni(keys[8], (latent_dim, h_features), h_features),
        "b_mean": uni(keys[9], (latent_dim,), h_features),
        "w_logvar": uni(keys[10], (latent_dim, h_features), h_features),
        "b_logvar": uni(keys[11], (latent_dim,), h_features),
    }

    inputs = jax.random.normal(keys[12], (batch, seq_len, input_features), jnp.float32)
    # torch.randn_like(std) in reparametrize -> pass explicit standard-normal noise.
    eps = jax.random.normal(keys[13], (batch, latent_dim), jnp.float32)

    # One-time parameter prep (transposes/casts/bias combines/slab packing).
    prepped = jax.tree_util.tree_map(jax.block_until_ready, prepare_params(params))

    forward = jax.jit(lstm_encoder_forward)
    z_sample, z_mean, z_logvar = jax.block_until_ready(forward(prepped, inputs, eps))

    zs_ref, zm_ref, zl_ref = _forward_ref(params, inputs, eps)
    np.testing.assert_allclose(np.asarray(z_mean), np.asarray(zm_ref), rtol=1e-4, atol=1e-4)
    np.testing.assert_allclose(np.asarray(z_logvar), np.asarray(zl_ref), rtol=1e-4, atol=1e-4)
    np.testing.assert_allclose(np.asarray(z_sample), np.asarray(zs_ref), rtol=1e-4, atol=1e-4)

    print("KERNEL_OK")
</pallas_src>

<mosaic_0001>
module attributes {stable_mosaic.version = 11 : i64} {
  func.func @_encoder_kernel(%arg0: memref<16x159xf32, #tpu.memory_space<vmem>>, %arg1: memref<159x128xf32, #tpu.memory_space<vmem>>, %arg2: memref<96x128xf32, #tpu.memory_space<vmem>>, %arg3: memref<3x128xf32, #tpu.memory_space<vmem>>, %arg4: memref<32x64xf32, #tpu.memory_space<vmem>>, %arg5: memref<2x32xf32, #tpu.memory_space<vmem>>, %arg6: memref<2x96xf32, #tpu.memory_space<vmem>>) attributes {dimension_semantics = [], scalar_prefetch = 0 : i64, scratch_operands = 0 : i64, tpu.core_type = #tpu.core_type<tc>} {
    %c0 = arith.constant 0 : index
    %c0_0 = arith.constant 0 : index
    %0 = vector.load %arg2[%c0, %c0_0] : memref<96x128xf32, #tpu.memory_space<vmem>>, vector<96x128xf32>
    %1 = vector.extract_strided_slice %0 {offsets = [0, 0], sizes = [32, 128], strides = [1, 1]} : vector<96x128xf32> to vector<32x128xf32>
    %2 = vector.extract_strided_slice %0 {offsets = [32, 0], sizes = [32, 128], strides = [1, 1]} : vector<96x128xf32> to vector<32x128xf32>
    %3 = vector.extract_strided_slice %0 {offsets = [64, 0], sizes = [32, 128], strides = [1, 1]} : vector<96x128xf32> to vector<32x128xf32>
    %c0_1 = arith.constant 0 : index
    %c0_2 = arith.constant 0 : index
    %4 = vector.load %arg3[%c0_1, %c0_2] : memref<3x128xf32, #tpu.memory_space<vmem>>, vector<1x128xf32>
    %c1 = arith.constant 1 : index
    %c0_3 = arith.constant 0 : index
    %5 = vector.load %arg3[%c1, %c0_3] : memref<3x128xf32, #tpu.memory_space<vmem>>, vector<1x128xf32>
    %c2 = arith.constant 2 : index
    %c0_4 = arith.constant 0 : index
    %6 = vector.load %arg3[%c2, %c0_4] : memref<3x128xf32, #tpu.memory_space<vmem>>, vector<1x64xf32>
    %c0_5 = arith.constant 0 : index
    %c0_6 = arith.constant 0 : index
    %7 = vector.load %arg0[%c0_5, %c0_6] : memref<16x159xf32, #tpu.memory_space<vmem>>, vector<16x159xf32>
    %c0_7 = arith.constant 0 : index
    %c0_8 = arith.constant 0 : index
    %8 = vector.load %arg1[%c0_7, %c0_8] : memref<159x128xf32, #tpu.memory_space<vmem>>, vector<159x128xf32>
    %cst = arith.constant dense<0.000000e+00> : vector<16x128xf32>
    %9 = tpu.matmul %7, %8, %cst {dimension_numbers = #tpu.dot_dimension_numbers<[1], [0], [0], [1], [0, 0, 1, 1], [], []>} : vector<16x159xf32>, vector<159x128xf32>, vector<16x128xf32> -> vector<16x128xf32>
    %10 = vector.broadcast %4 : vector<1x128xf32> to vector<16x128xf32>
    %11 = arith.addf %9, %10 : vector<16x128xf32>
    %cst_9 = arith.constant 0.000000e+00 : f32
    %12 = vector.broadcast %cst_9 : f32 to vector<2x32xf32>
    %13 = vector.extract_strided_slice %11 {offsets = [0, 0], sizes = [2, 128], strides = [1, 1]} : vector<16x128xf32> to vector<2x128xf32>
    %cst_10 = arith.constant dense<0.000000e+00> : vector<2x128xf32>
    %14 = tpu.matmul %12, %1, %cst_10 {dimension_numbers = #tpu.dot_dimension_numbers<[1], [0], [0], [1], [0, 0, 1, 1], [], []>} : vector<2x32xf32>, vector<32x128xf32>, vector<2x128xf32> -> vector<2x128xf32>
    %15 = arith.addf %13, %14 : vector<2x128xf32>
    %16 = arith.negf %15 : vector<2x128xf32>
    %17 = math.exp %16 : vector<2x128xf32>
    %cst_11 = arith.constant 1.000000e+00 : f32
    %18 = vector.broadcast %cst_11 : f32 to vector<2x128xf32>
    %19 = arith.addf %18, %17 : vector<2x128xf32>
    %20 = arith.divf %18, %19 : vector<2x128xf32>
    %21 = math.tanh %15 : vector<2x128xf32>
    %22 = vector.extract_strided_slice %20 {offsets = [0, 0], sizes = [2, 32], strides = [1, 1]} : vector<2x128xf32> to vector<2x32xf32>
    %23 = vector.extract_strided_slice %20 {offsets = [0, 32], sizes = [2, 32], strides = [1, 1]} : vector<2x128xf32> to vector<2x32xf32>
    %24 = vector.extract_strided_slice %21 {offsets = [0, 64], sizes = [2, 32], strides = [1, 1]} : vector<2x128xf32> to vector<2x32xf32>
    %25 = vector.extract_strided_slice %20 {offsets = [0, 96], sizes = [2, 32], strides = [1, 1]} : vector<2x128xf32> to vector<2x32xf32>
    %26 = arith.mulf %23, %12 : vector<2x32xf32>
    %27 = arith.mulf %22, %24 : vector<2x32xf32>
    %28 = arith.addf %26, %27 : vector<2x32xf32>
    %29 = math.tanh %28 : vector<2x32xf32>
    %30 = arith.mulf %25, %29 : vector<2x32xf32>
    %cst_12 = arith.constant dense<0.000000e+00> : vector<2x128xf32>
    %31 = tpu.matmul %30, %2, %cst_12 {dimension_numbers = #tpu.dot_dimension_numbers<[1], [0], [0], [1], [0, 0, 1, 1], [], []>} : vector<2x32xf32>, vector<32x128xf32>, vector<2x128xf32> -> vector<2x128xf32>
    %cst_13 = arith.constant dense<0.000000e+00> : vector<2x128xf32>
    %32 = tpu.matmul %12, %3, %cst_13 {dimension_numbers = #tpu.dot_dimension_numbers<[1], [0], [0], [1], [0, 0, 1, 1], [], []>} : vector<2x32xf32>, vector<32x128xf32>, vector<2x128xf32> -> vector<2x128xf32>
    %33 = arith.addf %31, %32 : vector<2x128xf32>
    %34 = vector.broadcast %5 : vector<1x128xf32> to vector<2x128xf32>
    %35 = arith.addf %33, %34 : vector<2x128xf32>
    %36 = arith.negf %35 : vector<2x128xf32>
    %37 = math.exp %36 : vector<2x128xf32>
    %cst_14 = arith.constant 1.000000e+00 : f32
    %38 = vector.broadcast %cst_14 : f32 to vector<2x128xf32>
    %39 = arith.addf %38, %37 : vector<2x128xf32>
    %40 = arith.divf %38, %39 : vector<2x128xf32>
    %41 = math.tanh %35 : vector<2x128xf32>
    %42 = vector.extract_strided_slice %40 {offsets = [0, 0], sizes = [2, 32], strides = [1, 1]} : vector<2x128xf32> to vector<2x32xf32>
    %43 = vector.extract_strided_slice %40 {offsets = [0, 32], sizes = [2, 32], strides = [1, 1]} : vector<2x128xf32> to vector<2x32xf32>
    %44 = vector.extract_strided_slice %41 {offsets = [0, 64], sizes = [2, 32], strides = [1, 1]} : vector<2x128xf32> to vector<2x32xf32>
    %45 = vector.extract_strided_slice %40 {offsets = [0, 96], sizes = [2, 32], strides = [1, 1]} : vector<2x128xf32> to vector<2x32xf32>
    %46 = arith.mulf %43, %12 : vector<2x32xf32>
    %47 = arith.mulf %42, %44 : vector<2x32xf32>
    %48 = arith.addf %46, %47 : vector<2x32xf32>
    %49 = math.tanh %48 : vector<2x32xf32>
    %50 = arith.mulf %45, %49 : vector<2x32xf32>
    %51 = vector.extract_strided_slice %11 {offsets = [2, 0], sizes = [2, 128], strides = [1, 1]} : vector<16x128xf32> to vector<2x128xf32>
    %cst_15 = arith.constant dense<0.000000e+00> : vector<2x128xf32>
    %52 = tpu.matmul %30, %1, %cst_15 {dimension_numbers = #tpu.dot_dimension_numbers<[1], [0], [0], [1], [0, 0, 1, 1], [], []>} : vector<2x32xf32>, vector<32x128xf32>, vector<2x128xf32> -> vector<2x128xf32>
    %53 = arith.addf %51, %52 : vector<2x128xf32>
    %54 = arith.negf %53 : vector<2x128xf32>
    %55 = math.exp %54 : vector<2x128xf32>
    %cst_16 = arith.constant 1.000000e+00 : f32
    %56 = vector.broadcast %cst_16 : f32 to vector<2x128xf32>
    %57 = arith.addf %56, %55 : vector<2x128xf32>
    %58 = arith.divf %56, %57 : vector<2x128xf32>
    %59 = math.tanh %53 : vector<2x128xf32>
    %60 = vector.extract_strided_slice %58 {offsets = [0, 0], sizes = [2, 32], strides = [1, 1]} : vector<2x128xf32> to vector<2x32xf32>
    %61 = vector.extract_strided_slice %58 {offsets = [0, 32], sizes = [2, 32], strides = [1, 1]} : vector<2x128xf32> to vector<2x32xf32>
    %62 = vector.extract_strided_slice %59 {offsets = [0, 64], sizes = [2, 32], strides = [1, 1]} : vector<2x128xf32> to vector<2x32xf32>
    %63 = vector.extract_strided_slice %58 {offsets = [0, 96], sizes = [2, 32], strides = [1, 1]} : vector<2x128xf32> to vector<2x32xf32>
    %64 = arith.mulf %61, %28 : vector<2x32xf32>
    %65 = arith.mulf %60, %62 : vector<2x32xf32>
    %66 = arith.addf %64, %65 : vector<2x32xf32>
    %67 = math.tanh %66 : vector<2x32xf32>
    %68 = arith.mulf %63, %67 : vector<2x32xf32>
    %cst_17 = arith.constant dense<0.000000e+00> : vector<2x128xf32>
    %69 = tpu.matmul %68, %2, %cst_17 {dimension_numbers = #tpu.dot_dimension_numbers<[1], [0], [0], [1], [0, 0, 1, 1], [], []>} : vector<2x32xf32>, vector<32x128xf32>, vector<2x128xf32> -> vector<2x128xf32>
    %cst_18 = arith.constant dense<0.000000e+00> : vector<2x128xf32>
    %70 = tpu.matmul %50, %3, %cst_18 {dimension_numbers = #tpu.dot_dimension_numbers<[1], [0], [0], [1], [0, 0, 1, 1], [], []>} : vector<2x32xf32>, vector<32x128xf32>, vector<2x128xf32> -> vector<2x128xf32>
    %71 = arith.addf %69, %70 : vector<2x128xf32>
    %72 = vector.broadcast %5 : vector<1x128xf32> to vector<2x128xf32>
    %73 = arith.addf %71, %72 : vector<2x128xf32>
    %74 = arith.negf %73 : vector<2x128xf32>
    %75 = math.exp %74 : vector<2x128xf32>
    %cst_19 = arith.constant 1.000000e+00 : f32
    %76 = vector.broadcast %cst_19 : f32 to vector<2x128xf32>
    %77 = arith.addf %76, %75 : vector<2x128xf32>
    %78 = arith.divf %76, %77 : vector<2x128xf32>
    %79 = math.tanh %73 : vector<2x128xf32>
    %80 = vector.extract_strided_slice %78 {offsets = [0, 0], sizes = [2, 32], strides = [1, 1]} : vector<2x128xf32> to vector<2x32xf32>
    %81 = vector.extract_strided_slice %78 {offsets = [0, 32], sizes = [2, 32], strides = [1, 1]} : vector<2x128xf32> to vector<2x32xf32>
    %82 = vector.extract_strided_slice %79 {offsets = [0, 64], sizes = [2, 32], strides = [1, 1]} : vector<2x128xf32> to vector<2x32xf32>
    %83 = vector.extract_strided_slice %78 {offsets = [0, 96], sizes = [2, 32], strides = [1, 1]} : vector<2x128xf32> to vector<2x32xf32>
    %84 = arith.mulf %81, %48 : vector<2x32xf32>
    %85 = arith.mulf %80, %82 : vector<2x32xf32>
    %86 = arith.addf %84, %85 : vector<2x32xf32>
    %87 = math.tanh %86 : vector<2x32xf32>
    %88 = arith.mulf %83, %87 : vector<2x32xf32>
    %89 = vector.extract_strided_slice %11 {offsets = [4, 0], sizes = [2, 128], strides = [1, 1]} : vector<16x128xf32> to vector<2x128xf32>
    %cst_20 = arith.constant dense<0.000000e+00> : vector<2x128xf32>
    %90 = tpu.matmul %68, %1, %cst_20 {dimension_numbers = #tpu.dot_dimension_numbers<[1], [0], [0], [1], [0, 0, 1, 1], [], []>} : vector<2x32xf32>, vector<32x128xf32>, vector<2x128xf32> -> vector<2x128xf32>
    %91 = arith.addf %89, %90 : vector<2x128xf32>
    %92 = arith.negf %91 : vector<2x128xf32>
    %93 = math.exp %92 : vector<2x128xf32>
    %cst_21 = arith.constant 1.000000e+00 : f32
    %94 = vector.broadcast %cst_21 : f32 to vector<2x128xf32>
    %95 = arith.addf %94, %93 : vector<2x128xf32>
    %96 = arith.divf %94, %95 : vector<2x128xf32>
    %97 = math.tanh %91 : vector<2x128xf32>
    %98 = vector.extract_strided_slice %96 {offsets = [0, 0], sizes = [2, 32], strides = [1, 1]} : vector<2x128xf32> to vector<2x32xf32>
    %99 = vector.extract_strided_slice %96 {offsets = [0, 32], sizes = [2, 32], strides = [1, 1]} : vector<2x128xf32> to vector<2x32xf32>
    %100 = vector.extract_strided_slice %97 {offsets = [0, 64], sizes = [2, 32], strides = [1, 1]} : vector<2x128xf32> to vector<2x32xf32>
    %101 = vector.extract_strided_slice %96 {offsets = [0, 96], sizes = [2, 32], strides = [1, 1]} : vector<2x128xf32> to vector<2x32xf32>
    %102 = arith.mulf %99, %66 : vector<2x32xf32>
    %103 = arith.mulf %98, %100 : vector<2x32xf32>
    %104 = arith.addf %102, %103 : vector<2x32xf32>
    %105 = math.tanh %104 : vector<2x32xf32>
    %106 = arith.mulf %101, %105 : vector<2x32xf32>
    %cst_22 = arith.constant dense<0.000000e+00> : vector<2x128xf32>
    %107 = tpu.matmul %106, %2, %cst_22 {dimension_numbers = #tpu.dot_dimension_numbers<[1], [0], [0], [1], [0, 0, 1, 1], [], []>} : vector<2x32xf32>, vector<32x128xf32>, vector<2x128xf32> -> vector<2x128xf32>
    %cst_23 = arith.constant dense<0.000000e+00> : vector<2x128xf32>
    %108 = tpu.matmul %88, %3, %cst_23 {dimension_numbers = #tpu.dot_dimension_numbers<[1], [0], [0], [1], [0, 0, 1, 1], [], []>} : vector<2x32xf32>, vector<32x128xf32>, vector<2x128xf32> -> vector<2x128xf32>
    %109 = arith.addf %107, %108 : vector<2x128xf32>
    %110 = vector.broadcast %5 : vector<1x128xf32> to vector<2x128xf32>
    %111 = arith.addf %109, %110 : vector<2x128xf32>
    %112 = arith.negf %111 : vector<2x128xf32>
    %113 = math.exp %112 : vector<2x128xf32>
    %cst_24 = arith.constant 1.000000e+00 : f32
    %114 = vector.broadcast %cst_24 : f32 to vector<2x128xf32>
    %115 = arith.addf %114, %113 : vector<2x128xf32>
    %116 = arith.divf %114, %115 : vector<2x128xf32>
    %117 = math.tanh %111 : vector<2x128xf32>
    %118 = vector.extract_strided_slice %116 {offsets = [0, 0], sizes = [2, 32], strides = [1, 1]} : vector<2x128xf32> to vector<2x32xf32>
    %119 = vector.extract_strided_slice %116 {offsets = [0, 32], sizes = [2, 32], strides = [1, 1]} : vector<2x128xf32> to vector<2x32xf32>
    %120 = vector.extract_strided_slice %117 {offsets = [0, 64], sizes = [2, 32], strides = [1, 1]} : vector<2x128xf32> to vector<2x32xf32>
    %121 = vector.extract_strided_slice %116 {offsets = [0, 96], sizes = [2, 32], strides = [1, 1]} : vector<2x128xf32> to vector<2x32xf32>
    %122 = arith.mulf %119, %86 : vector<2x32xf32>
    %123 = arith.mulf %118, %120 : vector<2x32xf32>
    %124 = arith.addf %122, %123 : vector<2x32xf32>
    %125 = math.tanh %124 : vector<2x32xf32>
    %126 = arith.mulf %121, %125 : vector<2x32xf32>
    %127 = vector.extract_strided_slice %11 {offsets = [6, 0], sizes = [2, 128], strides = [1, 1]} : vector<16x128xf32> to vector<2x128xf32>
    %cst_25 = arith.constant dense<0.000000e+00> : vector<2x128xf32>
    %128 = tpu.matmul %106, %1, %cst_25 {dimension_numbers = #tpu.dot_dimension_numbers<[1], [0], [0], [1], [0, 0, 1, 1], [], []>} : vector<2x32xf32>, vector<32x128xf32>, vector<2x128xf32> -> vector<2x128xf32>
    %129 = arith.addf %127, %128 : vector<2x128xf32>
    %130 = arith.negf %129 : vector<2x128xf32>
    %131 = math.exp %130 : vector<2x128xf32>
    %cst_26 = arith.constant 1.000000e+00 : f32
    %132 = vector.broadcast %cst_26 : f32 to vector<2x128xf32>
    %133 = arith.addf %132, %131 : vector<2x128xf32>
    %134 = arith.divf %132, %133 : vector<2x128xf32>
    %135 = math.tanh %129 : vector<2x128xf32>
    %136 = vector.extract_strided_slice %134 {offsets = [0, 0], sizes = [2, 32], strides = [1, 1]} : vector<2x128xf32> to vector<2x32xf32>
    %137 = vector.extract_strided_slice %134 {offsets = [0, 32], sizes = [2, 32], strides = [1, 1]} : vector<2x128xf32> to vector<2x32xf32>
    %138 = vector.extract_strided_slice %135 {offsets = [0, 64], sizes = [2, 32], strides = [1, 1]} : vector<2x128xf32> to vector<2x32xf32>
    %139 = vector.extract_strided_slice %134 {offsets = [0, 96], sizes = [2, 32], strides = [1, 1]} : vector<2x128xf32> to vector<2x32xf32>
    %140 = arith.mulf %137, %104 : vector<2x32xf32>
    %141 = arith.mulf %136, %138 : vector<2x32xf32>
    %142 = arith.addf %140, %141 : vector<2x32xf32>
    %143 = math.tanh %142 : vector<2x32xf32>
    %144 = arith.mulf %139, %143 : vector<2x32xf32>
    %cst_27 = arith.constant dense<0.000000e+00> : vector<2x128xf32>
    %145 = tpu.matmul %144, %2, %cst_27 {dimension_numbers = #tpu.dot_dimension_numbers<[1], [0], [0], [1], [0, 0, 1, 1], [], []>} : vector<2x32xf32>, vector<32x128xf32>, vector<2x128xf32> -> vector<2x128xf32>
    %cst_28 = arith.constant dense<0.000000e+00> : vector<2x128xf32>
    %146 = tpu.matmul %126, %3, %cst_28 {dimension_numbers = #tpu.dot_dimension_numbers<[1], [0], [0], [1], [0, 0, 1, 1], [], []>} : vector<2x32xf32>, vector<32x128xf32>, vector<2x128xf32> -> vector<2x128xf32>
    %147 = arith.addf %145, %146 : vector<2x128xf32>
    %148 = vector.broadcast %5 : vector<1x128xf32> to vector<2x128xf32>
    %149 = arith.addf %147, %148 : vector<2x128xf32>
    %150 = arith.negf %149 : vector<2x128xf32>
    %151 = math.exp %150 : vector<2x128xf32>
    %cst_29 = arith.constant 1.000000e+00 : f32
    %152 = vector.broadcast %cst_29 : f32 to vector<2x128xf32>
    %153 = arith.addf %152, %151 : vector<2x128xf32>
    %154 = arith.divf %152, %153 : vector<2x128xf32>
    %155 = math.tanh %149 : vector<2x128xf32>
    %156 = vector.extract_strided_slice %154 {offsets = [0, 0], sizes = [2, 32], strides = [1, 1]} : vector<2x128xf32> to vector<2x32xf32>
    %157 = vector.extract_strided_slice %154 {offsets = [0, 32], sizes = [2, 32], strides = [1, 1]} : vector<2x128xf32> to vector<2x32xf32>
    %158 = vector.extract_strided_slice %155 {offsets = [0, 64], sizes = [2, 32], strides = [1, 1]} : vector<2x128xf32> to vector<2x32xf32>
    %159 = vector.extract_strided_slice %154 {offsets = [0, 96], sizes = [2, 32], strides = [1, 1]} : vector<2x128xf32> to vector<2x32xf32>
    %160 = arith.mulf %157, %124 : vector<2x32xf32>
    %161 = arith.mulf %156, %158 : vector<2x32xf32>
    %162 = arith.addf %160, %161 : vector<2x32xf32>
    %163 = math.tanh %162 : vector<2x32xf32>
    %164 = arith.mulf %159, %163 : vector<2x32xf32>
    %165 = vector.extract_strided_slice %11 {offsets = [8, 0], sizes = [2, 128], strides = [1, 1]} : vector<16x128xf32> to vector<2x128xf32>
    %cst_30 = arith.constant dense<0.000000e+00> : vector<2x128xf32>
    %166 = tpu.matmul %144, %1, %cst_30 {dimension_numbers = #tpu.dot_dimension_numbers<[1], [0], [0], [1], [0, 0, 1, 1], [], []>} : vector<2x32xf32>, vector<32x128xf32>, vector<2x128xf32> -> vector<2x128xf32>
    %167 = arith.addf %165, %166 : vector<2x128xf32>
    %168 = arith.negf %167 : vector<2x128xf32>
    %169 = math.exp %168 : vector<2x128xf32>
    %cst_31 = arith.constant 1.000000e+00 : f32
    %170 = vector.broadcast %cst_31 : f32 to vector<2x128xf32>
    %171 = arith.addf %170, %169 : vector<2x128xf32>
    %172 = arith.divf %170, %171 : vector<2x128xf32>
    %173 = math.tanh %167 : vector<2x128xf32>
    %174 = vector.extract_strided_slice %172 {offsets = [0, 0], sizes = [2, 32], strides = [1, 1]} : vector<2x128xf32> to vector<2x32xf32>
    %175 = vector.extract_strided_slice %172 {offsets = [0, 32], sizes = [2, 32], strides = [1, 1]} : vector<2x128xf32> to vector<2x32xf32>
    %176 = vector.extract_strided_slice %173 {offsets = [0, 64], sizes = [2, 32], strides = [1, 1]} : vector<2x128xf32> to vector<2x32xf32>
    %177 = vector.extract_strided_slice %172 {offsets = [0, 96], sizes = [2, 32], strides = [1, 1]} : vector<2x128xf32> to vector<2x32xf32>
    %178 = arith.mulf %175, %142 : vector<2x32xf32>
    %179 = arith.mulf %174, %176 : vector<2x32xf32>
    %180 = arith.addf %178, %179 : vector<2x32xf32>
    %181 = math.tanh %180 : vector<2x32xf32>
    %182 = arith.mulf %177, %181 : vector<2x32xf32>
    %cst_32 = arith.constant dense<0.000000e+00> : vector<2x128xf32>
    %183 = tpu.matmul %182, %2, %cst_32 {dimension_numbers = #tpu.dot_dimension_numbers<[1], [0], [0], [1], [0, 0, 1, 1], [], []>} : vector<2x32xf32>, vector<32x128xf32>, vector<2x128xf32> -> vector<2x128xf32>
    %cst_33 = arith.constant dense<0.000000e+00> : vector<2x128xf32>
    %184 = tpu.matmul %164, %3, %cst_33 {dimension_numbers = #tpu.dot_dimension_numbers<[1], [0], [0], [1], [0, 0, 1, 1], [], []>} : vector<2x32xf32>, vector<32x128xf32>, vector<2x128xf32> -> vector<2x128xf32>
    %185 = arith.addf %183, %184 : vector<2x128xf32>
    %186 = vector.broadcast %5 : vector<1x128xf32> to vector<2x128xf32>
    %187 = arith.addf %185, %186 : vector<2x128xf32>
    %188 = arith.negf %187 : vector<2x128xf32>
    %189 = math.exp %188 : vector<2x128xf32>
    %cst_34 = arith.constant 1.000000e+00 : f32
    %190 = vector.broadcast %cst_34 : f32 to vector<2x128xf32>
    %191 = arith.addf %190, %189 : vector<2x128xf32>
    %192 = arith.divf %190, %191 : vector<2x128xf32>
    %193 = math.tanh %187 : vector<2x128xf32>
    %194 = vector.extract_strided_slice %192 {offsets = [0, 0], sizes = [2, 32], strides = [1, 1]} : vector<2x128xf32> to vector<2x32xf32>
    %195 = vector.extract_strided_slice %192 {offsets = [0, 32], sizes = [2, 32], strides = [1, 1]} : vector<2x128xf32> to vector<2x32xf32>
    %196 = vector.extract_strided_slice %193 {offsets = [0, 64], sizes = [2, 32], strides = [1, 1]} : vector<2x128xf32> to vector<2x32xf32>
    %197 = vector.extract_strided_slice %192 {offsets = [0, 96], sizes = [2, 32], strides = [1, 1]} : vector<2x128xf32> to vector<2x32xf32>
    %198 = arith.mulf %195, %162 : vector<2x32xf32>
    %199 = arith.mulf %194, %196 : vector<2x32xf32>
    %200 = arith.addf %198, %199 : vector<2x32xf32>
    %201 = math.tanh %200 : vector<2x32xf32>
    %202 = arith.mulf %197, %201 : vector<2x32xf32>
    %203 = vector.extract_strided_slice %11 {offsets = [10, 0], sizes = [2, 128], strides = [1, 1]} : vector<16x128xf32> to vector<2x128xf32>
    %cst_35 = arith.constant dense<0.000000e+00> : vector<2x128xf32>
    %204 = tpu.matmul %182, %1, %cst_35 {dimension_numbers = #tpu.dot_dimension_numbers<[1], [0], [0], [1], [0, 0, 1, 1], [], []>} : vector<2x32xf32>, vector<32x128xf32>, vector<2x128xf32> -> vector<2x128xf32>
    %205 = arith.addf %203, %204 : vector<2x128xf32>
    %206 = arith.negf %205 : vector<2x128xf32>
    %207 = math.exp %206 : vector<2x128xf32>
    %cst_36 = arith.constant 1.000000e+00 : f32
    %208 = vector.broadcast %cst_36 : f32 to vector<2x128xf32>
    %209 = arith.addf %208, %207 : vector<2x128xf32>
    %210 = arith.divf %208, %209 : vector<2x128xf32>
    %211 = math.tanh %205 : vector<2x128xf32>
    %212 = vector.extract_strided_slice %210 {offsets = [0, 0], sizes = [2, 32], strides = [1, 1]} : vector<2x128xf32> to vector<2x32xf32>
    %213 = vector.extract_strided_slice %210 {offsets = [0, 32], sizes = [2, 32], strides = [1, 1]} : vector<2x128xf32> to vector<2x32xf32>
    %214 = vector.extract_strided_slice %211 {offsets = [0, 64], sizes = [2, 32], strides = [1, 1]} : vector<2x128xf32> to vector<2x32xf32>
    %215 = vector.extract_strided_slice %210 {offsets = [0, 96], sizes = [2, 32], strides = [1, 1]} : vector<2x128xf32> to vector<2x32xf32>
    %216 = arith.mulf %213, %180 : vector<2x32xf32>
    %217 = arith.mulf %212, %214 : vector<2x32xf32>
    %218 = arith.addf %216, %217 : vector<2x32xf32>
    %219 = math.tanh %218 : vector<2x32xf32>
    %220 = arith.mulf %215, %219 : vector<2x32xf32>
    %cst_37 = arith.constant dense<0.000000e+00> : vector<2x128xf32>
    %221 = tpu.matmul %220, %2, %cst_37 {dimension_numbers = #tpu.dot_dimension_numbers<[1], [0], [0], [1], [0, 0, 1, 1], [], []>} : vector<2x32xf32>, vector<32x128xf32>, vector<2x128xf32> -> vector<2x128xf32>
    %cst_38 = arith.constant dense<0.000000e+00> : vector<2x128xf32>
    %222 = tpu.matmul %202, %3, %cst_38 {dimension_numbers = #tpu.dot_dimension_numbers<[1], [0], [0], [1], [0, 0, 1, 1], [], []>} : vector<2x32xf32>, vector<32x128xf32>, vector<2x128xf32> -> vector<2x128xf32>
    %223 = arith.addf %221, %222 : vector<2x128xf32>
    %224 = vector.broadcast %5 : vector<1x128xf32> to vector<2x128xf32>
    %225 = arith.addf %223, %224 : vector<2x128xf32>
    %226 = arith.negf %225 : vector<2x128xf32>
    %227 = math.exp %226 : vector<2x128xf32>
    %cst_39 = arith.constant 1.000000e+00 : f32
    %228 = vector.broadcast %cst_39 : f32 to vector<2x128xf32>
    %229 = arith.addf %228, %227 : vector<2x128xf32>
    %230 = arith.divf %228, %229 : vector<2x128xf32>
    %231 = math.tanh %225 : vector<2x128xf32>
    %232 = vector.extract_strided_slice %230 {offsets = [0, 0], sizes = [2, 32], strides = [1, 1]} : vector<2x128xf32> to vector<2x32xf32>
    %233 = vector.extract_strided_slice %230 {offsets = [0, 32], sizes = [2, 32], strides = [1, 1]} : vector<2x128xf32> to vector<2x32xf32>
    %234 = vector.extract_strided_slice %231 {offsets = [0, 64], sizes = [2, 32], strides = [1, 1]} : vector<2x128xf32> to vector<2x32xf32>
    %235 = vector.extract_strided_slice %230 {offsets = [0, 96], sizes = [2, 32], strides = [1, 1]} : vector<2x128xf32> to vector<2x32xf32>
    %236 = arith.mulf %233, %200 : vector<2x32xf32>
    %237 = arith.mulf %232, %234 : vector<2x32xf32>
    %238 = arith.addf %236, %237 : vector<2x32xf32>
    %239 = math.tanh %238 : vector<2x32xf32>
    %240 = arith.mulf %235, %239 : vector<2x32xf32>
    %241 = vector.extract_strided_slice %11 {offsets = [12, 0], sizes = [2, 128], strides = [1, 1]} : vector<16x128xf32> to vector<2x128xf32>
    %cst_40 = arith.constant dense<0.000000e+00> : vector<2x128xf32>
    %242 = tpu.matmul %220, %1, %cst_40 {dimension_numbers = #tpu.dot_dimension_numbers<[1], [0], [0], [1], [0, 0, 1, 1], [], []>} : vector<2x32xf32>, vector<32x128xf32>, vector<2x128xf32> -> vector<2x128xf32>
    %243 = arith.addf %241, %242 : vector<2x128xf32>
    %244 = arith.negf %243 : vector<2x128xf32>
    %245 = math.exp %244 : vector<2x128xf32>
    %cst_41 = arith.constant 1.000000e+00 : f32
    %246 = vector.broadcast %cst_41 : f32 to vector<2x128xf32>
    %247 = arith.addf %246, %245 : vector<2x128xf32>
    %248 = arith.divf %246, %247 : vector<2x128xf32>
    %249 = math.tanh %243 : vector<2x128xf32>
    %250 = vector.extract_strided_slice %248 {offsets = [0, 0], sizes = [2, 32], strides = [1, 1]} : vector<2x128xf32> to vector<2x32xf32>
    %251 = vector.extract_strided_slice %248 {offsets = [0, 32], sizes = [2, 32], strides = [1, 1]} : vector<2x128xf32> to vector<2x32xf32>
    %252 = vector.extract_strided_slice %249 {offsets = [0, 64], sizes = [2, 32], strides = [1, 1]} : vector<2x128xf32> to vector<2x32xf32>
    %253 = vector.extract_strided_slice %248 {offsets = [0, 96], sizes = [2, 32], strides = [1, 1]} : vector<2x128xf32> to vector<2x32xf32>
    %254 = arith.mulf %251, %218 : vector<2x32xf32>
    %255 = arith.mulf %250, %252 : vector<2x32xf32>
    %256 = arith.addf %254, %255 : vector<2x32xf32>
    %257 = math.tanh %256 : vector<2x32xf32>
    %258 = arith.mulf %253, %257 : vector<2x32xf32>
    %cst_42 = arith.constant dense<0.000000e+00> : vector<2x128xf32>
    %259 = tpu.matmul %258, %2, %cst_42 {dimension_numbers = #tpu.dot_dimension_numbers<[1], [0], [0], [1], [0, 0, 1, 1], [], []>} : vector<2x32xf32>, vector<32x128xf32>, vector<2x128xf32> -> vector<2x128xf32>
    %cst_43 = arith.constant dense<0.000000e+00> : vector<2x128xf32>
    %260 = tpu.matmul %240, %3, %cst_43 {dimension_numbers = #tpu.dot_dimension_numbers<[1], [0], [0], [1], [0, 0, 1, 1], [], []>} : vector<2x32xf32>, vector<32x128xf32>, vector<2x128xf32> -> vector<2x128xf32>
    %261 = arith.addf %259, %260 : vector<2x128xf32>
    %262 = vector.broadcast %5 : vector<1x128xf32> to vector<2x128xf32>
    %263 = arith.addf %261, %262 : vector<2x128xf32>
    %264 = arith.negf %263 : vector<2x128xf32>
    %265 = math.exp %264 : vector<2x128xf32>
    %cst_44 = arith.constant 1.000000e+00 : f32
    %266 = vector.broadcast %cst_44 : f32 to vector<2x128xf32>
    %267 = arith.addf %266, %265 : vector<2x128xf32>
    %268 = arith.divf %266, %267 : vector<2x128xf32>
    %269 = math.tanh %263 : vector<2x128xf32>
    %270 = vector.extract_strided_slice %268 {offsets = [0, 0], sizes = [2, 32], strides = [1, 1]} : vector<2x128xf32> to vector<2x32xf32>
    %271 = vector.extract_strided_slice %268 {offsets = [0, 32], sizes = [2, 32], strides = [1, 1]} : vector<2x128xf32> to vector<2x32xf32>
    %272 = vector.extract_strided_slice %269 {offsets = [0, 64], sizes = [2, 32], strides = [1, 1]} : vector<2x128xf32> to vector<2x32xf32>
    %273 = vector.extract_strided_slice %268 {offsets = [0, 96], sizes = [2, 32], strides = [1, 1]} : vector<2x128xf32> to vector<2x32xf32>
    %274 = arith.mulf %271, %238 : vector<2x32xf32>
    %275 = arith.mulf %270, %272 : vector<2x32xf32>
    %276 = arith.addf %274, %275 : vector<2x32xf32>
    %277 = math.tanh %276 : vector<2x32xf32>
    %278 = arith.mulf %273, %277 : vector<2x32xf32>
    %279 = vector.extract_strided_slice %11 {offsets = [14, 0], sizes = [2, 128], strides = [1, 1]} : vector<16x128xf32> to vector<2x128xf32>
    %cst_45 = arith.constant dense<0.000000e+00> : vector<2x128xf32>
    %280 = tpu.matmul %258, %1, %cst_45 {dimension_numbers = #tpu.dot_dimension_numbers<[1], [0], [0], [1], [0, 0, 1, 1], [], []>} : vector<2x32xf32>, vector<32x128xf32>, vector<2x128xf32> -> vector<2x128xf32>
    %281 = arith.addf %279, %280 : vector<2x128xf32>
    %282 = arith.negf %281 : vector<2x128xf32>
    %283 = math.exp %282 : vector<2x128xf32>
    %cst_46 = arith.constant 1.000000e+00 : f32
    %284 = vector.broadcast %cst_46 : f32 to vector<2x128xf32>
    %285 = arith.addf %284, %283 : vector<2x128xf32>
    %286 = arith.divf %284, %285 : vector<2x128xf32>
    %287 = math.tanh %281 : vector<2x128xf32>
    %288 = vector.extract_strided_slice %286 {offsets = [0, 0], sizes = [2, 32], strides = [1, 1]} : vector<2x128xf32> to vector<2x32xf32>
    %289 = vector.extract_strided_slice %286 {offsets = [0, 32], sizes = [2, 32], strides = [1, 1]} : vector<2x128xf32> to vector<2x32xf32>
    %290 = vector.extract_strided_slice %287 {offsets = [0, 64], sizes = [2, 32], strides = [1, 1]} : vector<2x128xf32> to vector<2x32xf32>
    %291 = vector.extract_strided_slice %286 {offsets = [0, 96], sizes = [2, 32], strides = [1, 1]} : vector<2x128xf32> to vector<2x32xf32>
    %292 = arith.mulf %289, %256 : vector<2x32xf32>
    %293 = arith.mulf %288, %290 : vector<2x32xf32>
    %294 = arith.addf %292, %293 : vector<2x32xf32>
    %295 = math.tanh %294 : vector<2x32xf32>
    %296 = arith.mulf %291, %295 : vector<2x32xf32>
    %cst_47 = arith.constant dense<0.000000e+00> : vector<2x128xf32>
    %297 = tpu.matmul %296, %2, %cst_47 {dimension_numbers = #tpu.dot_dimension_numbers<[1], [0], [0], [1], [0, 0, 1, 1], [], []>} : vector<2x32xf32>, vector<32x128xf32>, vector<2x128xf32> -> vector<2x128xf32>
    %cst_48 = arith.constant dense<0.000000e+00> : vector<2x128xf32>
    %298 = tpu.matmul %278, %3, %cst_48 {dimension_numbers = #tpu.dot_dimension_numbers<[1], [0], [0], [1], [0, 0, 1, 1], [], []>} : vector<2x32xf32>, vector<32x128xf32>, vector<2x128xf32> -> vector<2x128xf32>
    %299 = arith.addf %297, %298 : vector<2x128xf32>
    %300 = vector.broadcast %5 : vector<1x128xf32> to vector<2x128xf32>
    %301 = arith.addf %299, %300 : vector<2x128xf32>
    %302 = arith.negf %301 : vector<2x128xf32>
    %303 = math.exp %302 : vector<2x128xf32>
    %cst_49 = arith.constant 1.000000e+00 : f32
    %304 = vector.broadcast %cst_49 : f32 to vector<2x128xf32>
    %305 = arith.addf %304, %303 : vector<2x128xf32>
    %306 = arith.divf %304, %305 : vector<2x128xf32>
    %307 = math.tanh %301 : vector<2x128xf32>
    %308 = vector.extract_strided_slice %306 {offsets = [0, 0], sizes = [2, 32], strides = [1, 1]} : vector<2x128xf32> to vector<2x32xf32>
    %309 = vector.extract_strided_slice %306 {offsets = [0, 32], sizes = [2, 32], strides = [1, 1]} : vector<2x128xf32> to vector<2x32xf32>
    %310 = vector.extract_strided_slice %307 {offsets = [0, 64], sizes = [2, 32], strides = [1, 1]} : vector<2x128xf32> to vector<2x32xf32>
    %311 = vector.extract_strided_slice %306 {offsets = [0, 96], sizes = [2, 32], strides = [1, 1]} : vector<2x128xf32> to vector<2x32xf32>
    %312 = arith.mulf %309, %276 : vector<2x32xf32>
    %313 = arith.mulf %308, %310 : vector<2x32xf32>
    %314 = arith.addf %312, %313 : vector<2x32xf32>
    %315 = math.tanh %314 : vector<2x32xf32>
    %316 = arith.mulf %311, %315 : vector<2x32xf32>
    %c0_50 = arith.constant 0 : index
    %c0_51 = arith.constant 0 : index
    %317 = vector.load %arg4[%c0_50, %c0_51] : memref<32x64xf32, #tpu.memory_space<vmem>>, vector<32x64xf32>
    %cst_52 = arith.constant dense<0.000000e+00> : vector<2x64xf32>
    %318 = tpu.matmul %316, %317, %cst_52 {dimension_numbers = #tpu.dot_dimension_numbers<[1], [0], [0], [1], [0, 0, 1, 1], [], []>} : vector<2x32xf32>, vector<32x64xf32>, vector<2x64xf32> -> vector<2x64xf32>
    %319 = vector.broadcast %6 : vector<1x64xf32> to vector<2x64xf32>
    %320 = arith.addf %318, %319 : vector<2x64xf32>
    %321 = vector.extract_strided_slice %320 {offsets = [0, 0], sizes = [2, 32], strides = [1, 1]} : vector<2x64xf32> to vector<2x32xf32>
    %322 = vector.extract_strided_slice %320 {offsets = [0, 32], sizes = [2, 32], strides = [1, 1]} : vector<2x64xf32> to vector<2x32xf32>
    %c0_53 = arith.constant 0 : index
    %c0_54 = arith.constant 0 : index
    %323 = vector.load %arg5[%c0_53, %c0_54] : memref<2x32xf32, #tpu.memory_space<vmem>>, vector<2x32xf32>
    %cst_55 = arith.constant 5.000000e-01 : f32
    %324 = vector.broadcast %cst_55 : f32 to vector<2x32xf32>
    %325 = arith.mulf %324, %322 : vector<2x32xf32>
    %326 = math.exp %325 : vector<2x32xf32>
    %327 = arith.mulf %323, %326 : vector<2x32xf32>
    %328 = arith.addf %327, %321 : vector<2x32xf32>
    %329 = tpu.concatenate %328, %320 in 1 : vector<2x32xf32>, vector<2x64xf32> -> vector<2x96xf32>
    %c0_56 = arith.constant 0 : index
    %c0_57 = arith.constant 0 : index
    %330 = vector.load %arg6[%c0_56, %c0_57] : memref<2x96xf32, #tpu.memory_space<vmem>>, vector<2x96xf32>
    tpu.vector_store %arg6[%c0_56, %c0_57], %329 {strides = array<i32>} : memref<2x96xf32, #tpu.memory_space<vmem>>, vector<2x96xf32>,
    return
  }
}

</mosaic_0001>

<bundles_post_ra>
// kernel: lstm_encoder_forward.1
= control target key start
LH: loop header
LB: loop body
LE: loop exit
PB: predicated region body
PF: predicated region fallthrough
CT: control target
= control target key end

     0   :  { %11 = vsyncpa [#allocation3], 0  ;;  %s3270_s21 = smov [#allocation2]   ;;  %s3748_s0 = inlined_call_operand.vmem [shape: f32[16,159], index: 0, kind: input, shape index: {}]   ;;  %s3749_s1 = inlined_call_operand.hbm [shape: f32[159,128], index: 1, kind: input, shape index: {}]   ;;  %s3750_s2 = inlined_call_operand.vmem [shape: f32[96,128], index: 2, kind: input, shape index: {}]   ;;  %s3751_s3 = inlined_call_operand.vmem [shape: f32[3,128], index: 3, kind: input, shape index: {}]   ;;  %s3752_s4 = inlined_call_operand.vmem [shape: f32[32,64], index: 4, kind: input, shape index: {}]   ;;  %s3753_s5 = inlined_call_operand.vmem [shape: f32[2,32], index: 5, kind: input, shape index: {}]   ;;  %s3754_s6 = inlined_call_operand.vmem [shape: f32[2,96], index: 6, kind: output, shape index: {}]  }
   0x1   :  { %s19_s22 = sshll.u32 %s3270_s21, 4  ;;  %s3246_s25 = scalar_lea.hbm %s3749_s1, 2560  ;;  %s20_s22 = int_to_ptr.vmem [resolvable:$true] %s19_s22 }
   0x2   :  { %p3247_p0 = scmp.ne.s32.totalorder %s3749_s1, %s3246_s25  ;;  %p3250_p1 = scmp.lt.u32.totalorder %s3246_s25, %s3749_s1 }
   0x4   :  { %p3252_p2 = pnand %p3250_p1, %p3247_p0 }
   0x6   :  { %3255 = shalt.err (!%p3252_p2)
}
   0x7   :  { %s3256_s30 = scalar_lea.vmem %s20_s22, 2560  ;;  %p3261_p4 = scmp.lt.s32.totalorder %s20_s22, %s20_s22 }
   0x8   :  { %p3257_p3 = scmp.ne.s32.totalorder %s20_s22, %s3256_s30  ;;  %p3262_p5 = scmp.lt.s32.totalorder %s3256_s30, %s3256_s30 }
   0xa   :  { %p3263_p6 = por %p3262_p5, %p3261_p4 }
   0xc   :  { %p3264_p7 = pnand %p3263_p6, %p3257_p3 }
   0xe   :  { %3267 = shalt.err (!%p3264_p7)
}
   0xf   :  { %s3271_s7 = smov 128   ;;  %s3272_s8 = smov 8  }
  0x10   :  { %25 = dma.hbm_to_vmem [thread:$0]  %s3749_s1, 2560, %s20_s22, [#allocation3], %s3271_s7, %s3271_s7, %s3272_s8  }
  0x11   :  { %3268 = dma.done.wait [#allocation3], 2560  }
  0x12   :  { %3269 = vsyncadd [#allocation3], 4294964736  ;;  %v3273_v0 = vmov 0.0|0.0   ;;  %vm3274_vm0 = vmmov 0   ;;  %v3275_v1 = vmov 0.0   ;;  %v56_v2 = vld [vmem:[#allocation2] sm:$0xff] }
  0x13   :  { %2924 = vmatprep.subr.bf16.mxu0 %v3273_v0  ;;  %2955 = vmatprep.subr.bf16.mxu1 %v3273_v0  ;;  %v57_v3 = vld [vmem:[#allocation2 + $0x8] sm:$0xff]  ;;  %v58_v4 = vld [vmem:[#allocation2 + $0x10] sm:$0xff]  ;;  %v59_v6 = vld [vmem:[#allocation2 + $0x18] sm:$0xff]  ;;  %vm80_vm1 = vcmask 252928   ;;  %vm87_vm2 = vcmask 1046528   ;;  %vm3276_vm3 = vmmov 1  }
  0x14   :  { %2657 = vmatprep.mubr.msk.f32.mxu1 %vm3274_vm0, %v3275_v1  ;;  %v2925_v5 = vpack.c.bf16 %v57_v3, %v56_v2  ;;  %v2928_v7 = vpack.c.bf16 %v59_v6, %v58_v4  ;;  %v60_v8 = vld [vmem:[#allocation2 + $0x20] sm:$0xff]  ;;  %v61_v9 = vld [vmem:[#allocation2 + $0x28] sm:$0xff]  ;;  %v39_v14 = vld [vmem:[%s3750_s2 + $0x10] sm:$0xff]  ;;  %s3277_s24 = smov 64   ;;  %s3278_s25 = smov 32   ;;  %vm166_vm5 = vcmask 261120  }
  0x15   :  { %v37_v10 = vld [vmem:[%s3750_s2] sm:$0xff]  ;;  %v38_v11 = vld [vmem:[%s3750_s2 + $0x8] sm:$0xff]  ;;  %v2931_v12 = vpack.c.bf16 %v61_v9, %v60_v8  ;;  %v40_v15 = vld [vmem:[%s3750_s2 + $0x18] sm:$0xff]  ;;  %vm2472_vm6 = vcmask 779264  }
  0x16   :  { %2926 = vmatpush1.bf16.msra.mxu0 %v2925_v5  ;;  %v3338_v13 = vpack.c.bf16 %v38_v11, %v37_v10  ;;  %v62_v16 = vld [vmem:[#allocation2 + $0x30] sm:$0xff]  ;;  %v63_v17 = vld [vmem:[#allocation2 + $0x38] sm:$0xff]  ;;  %v53_v18 = vld [vmem:[%s3748_s0 + $0x8] sm:$0xff]  ;;  %v3351_v19 = vpack.c.bf16 %v40_v15, %v39_v14 }
  0x17   :  { %2927 = vmatprep.subr.bf16.mxu0 %v3273_v0  ;;  %2481 = vmatprep.mubr.msk.f32.mxu0 %vm80_vm1, %v53_v18  ;;  %v2934_v20 = vpack.c.bf16 %v63_v17, %v62_v16  ;;  %v64_v21 = vld [vmem:[#allocation2 + $0x40] sm:$0xff]  ;;  %v65_v22 = vld [vmem:[#allocation2 + $0x48] sm:$0xff]  ;;  %v66_v24 = vld [vmem:[#allocation2 + $0x50] sm:$0xff] }
  0x18   :  { %2957 = vmatpush3.bf16.msra.mxu1 %v3338_v13  ;;  %v2937_v23 = vpack.c.bf16 %v65_v22, %v64_v21  ;;  %v67_v25 = vld [vmem:[#allocation2 + $0x58] sm:$0xff]  ;;  %v68_v27 = vld [vmem:[#allocation2 + $0x60] sm:$0xff]  ;;  %v69_v28 = vld [vmem:[#allocation2 + $0x68] sm:$0xff] }
  0x19   :  { %2958 = vmatprep.subr.bf16.mxu1 %v3273_v0  ;;  %v2940_v26 = vpack.c.bf16 %v67_v25, %v66_v24  ;;  %v2943_v29 = vpack.c.bf16 %v69_v28, %v68_v27  ;;  %v70_v30 = vld [vmem:[#allocation2 + $0x70] sm:$0xff]  ;;  %v71_v31 = vld [vmem:[#allocation2 + $0x78] sm:$0xff]  ;;  %v72_v33 = vld [vmem:[#allocation2 + $0x80] sm:$0xff] }
  0x1a   :  { %2929 = vmatpush1.bf16.msra.mxu0 %v2928_v7  ;;  %v2946_v32 = vpack.c.bf16 %v71_v31, %v70_v30  ;;  %v73_v34 = vld [vmem:[#allocation2 + $0x88] sm:$0xff]  ;;  %v74_v36 = vld [vmem:[#allocation2 + $0x90] sm:$0xff]  ;;  %v75_v37 = vld [vmem:[#allocation2 + $0x98] sm:$0x7f] }
  0x1b   :  { %2930 = vmatprep.subr.bf16.mxu0 %v3273_v0  ;;  %v2949_v35 = vpack.c.bf16 %v73_v34, %v72_v33  ;;  %v2952_v38 = vpack.c.bf16 %v75_v37, %v74_v36  ;;  %vm2953_vm4 = vmpackc.low %vm87_vm2, %vm3276_vm3  ;;  %v52_v39 = vld [vmem:[%s3748_s0] sm:$0xff]  ;;  %v46_v58 = vld [vmem:[%s3750_s2 + $0x48] sm:$0xff] }
  0x1c   :  { %2960 = vmatpush3.bf16.msra.mxu1 %v3351_v19  ;;  %v3374_v42 = vld [vmem:[%s3751_s3] ss:$0 sm:$0xff]  ;;  %v47_v59 = vld [vmem:[%s3750_s2 + $0x50] sm:$0xff]  ;;  %v48_v61 = vld [vmem:[%s3750_s2 + $0x58] sm:$0xff] }
  0x1d   :  { %2961 = vmatprep.subr.bf16.mxu1 %v3273_v0  ;;  %v45_v57 = vld [vmem:[%s3750_s2 + $0x40] sm:$0xff]  ;;  %v42_v63 = vld [vmem:[%s3750_s2 + $0x28] sm:$0xff]  ;;  %v3408_v3 = vpack.c.bf16 %v48_v61, %v47_v59  ;;  %v43_v4 = vld [vmem:[%s3750_s2 + $0x30] sm:$0xff] }
  0x1e   :  { %2932 = vmatpush1.bf16.msra.mxu0 %v2931_v12  ;;  %v3394_v60 = vpack.c.bf16 %v46_v58, %v45_v57  ;;  %v41_v62 = vld [vmem:[%s3750_s2 + $0x20] sm:$0xff]  ;;  %v44_v5 = vld [vmem:[%s3750_s2 + $0x38] sm:$0xff] }
  0x1f   :  { %2933 = vmatprep.subr.bf16.mxu0 %v3273_v0  ;;  %2658 = vmatmul.mubr.f32.vlgmr.msra.gmra.mrb[0].mxu1 %v3275_v1  ;;  %v3405_v2 = vpack.c.bf16 %v42_v63, %v41_v62  ;;  %v3419_v6 = vpack.c.bf16 %v44_v5, %v43_v4  ;;  %v3451_v14 = vld [vmem:[%s3751_s3 + $0x1] ss:$0 sm:$0xff] }
  0x20   :  { %2668 = vmatprep.mubr.msk.f32.mxu1 %vm3274_vm0, %v3275_v1  ;;  %2963 = vmatpush3.bf16.msra.mxu1 %v3394_v60 }
  0x21   :  { %2964 = vmatprep.subr.bf16.mxu1 %v3273_v0 }
  0x22   :  { %2935 = vmatpush1.bf16.msra.mxu0 %v2934_v20 }
  0x23   :  { %2936 = vmatprep.subr.bf16.mxu0 %v3273_v0 }
  0x24   :  { %2966 = vmatpush3.bf16.msra.mxu1 %v3408_v3 }
  0x25   :  { %2967 = vmatprep.subr.bf16.mxu1 %v3273_v0 }
  0x26   :  { %2938 = vmatpush1.bf16.msra.mxu0 %v2937_v23 }
  0x27   :  { %2939 = vmatprep.subr.bf16.mxu0 %v3273_v0  ;;  %2669 = vmatmul.mubr.f32.vlgmr.msra.gmra.mrb[2].mxu1 %v3275_v1 }
  0x28   :  { %2969 = vmatpush3.bf16.msra.mxu1 %v3405_v2  ;;  %2679 = vmatprep.mubr.msk.f32.mxu1 %vm3274_vm0, %v3275_v1 }
  0x29   :  { %2970 = vmatprep.subr.bf16.mxu1 %v3273_v0 }
  0x2a   :  { %2941 = vmatpush1.bf16.msra.mxu0 %v2940_v26 }
  0x2b   :  { %2942 = vmatprep.subr.bf16.mxu0 %v3273_v0 }
  0x2c   :  { %2972 = vmatpush3.bf16.msra.mxu1 %v3419_v6 }
  0x2d   :  { %2973 = vmatprep.subr.bf16.mxu1 %v3273_v0 }
  0x2e   :  { %2944 = vmatpush1.bf16.msra.mxu0 %v2943_v29 }
  0x2f   :  { %2945 = vmatprep.subr.bf16.mxu0 %v3273_v0 }
  0x32   :  { %2947 = vmatpush1.bf16.msra.mxu0 %v2946_v32 }
  0x33   :  { %2948 = vmatprep.subr.bf16.mxu0 %v3273_v0 }
  0x36   :  { %2950 = vmatpush1.bf16.msra.mxu0 %v2949_v35 }
  0x37   :  { %2951 = vmatprep.subr.bf16.mxu0 %v3273_v0 }
  0x3a   :  { %2954 = vmatpush1.bf16.msk.msra.mxu0 %vm2953_vm4, %v2952_v38 }
  0x3b   :  { %2985 = vmatprep.subr.bf16.mxu0 %v3273_v0 }
  0x3d   :  { %156 = vmatmul.mubr.f32.vlgmr.msra.gmra.mrb[0].mxu0 %v52_v39 }
  0x3e   :  { %2987 = vmatpush3.bf16.msra.mxu0 %v3405_v2 }
  0x3f   :  { %2988 = vmatprep.subr.bf16.mxu0 %v3273_v0 }
  0x42   :  { %2990 = vmatpush3.bf16.msra.mxu0 %v3419_v6 }
  0x43   :  { %2997 = vmatprep.subr.bf16.mxu0 %v3273_v0 }
  0xf2   :  { %v236_v40 = vpop.f32.mrb[0].mxu1 }
  0xf3   :  { %v2659_v41 = vpop.f32.mrb[1].mxu1 }
  0xfa   :  { %v331_v10 = vpop.f32.mrb[2].mxu1 }
  0xfb   :  { %v2670_v11 = vpop.f32.mrb[3].mxu1 }
 0x110   :  { %v157_v43 = vpop.f32.mrb[0].mxu0 }
 0x111   :  { %v3377_v44 = vadd.f32 %v3374_v42, %v157_v43  ;;  %v159_v45 = vpop.f32.mrb[1].mxu0 }
 0x113   :  { %v240_v46 = vadd.f32 %v236_v40, %v3377_v44 }
 0x115   :  { %3115 = vtanh.f32 %v240_v46  ;;  %v2483_v48 = vmul.f32 -1.442695, %v240_v46 }
 0x117   :  { %3117 = vpow2.f32 %v2483_v48 }
 0x11f   :  { %v3116_v47 = vpop.eup %3115 }
 0x120   :  { %250 = vrot.lane.b32.xlu0 %v3116_v47, %s3277_s24 }
 0x121   :  { %v3118_v49 = vpop.eup %3117 }
 0x122   :  { %v244_v50 = vadd.f32 1.0, %v3118_v49  ;;  %v55_v49 = vld [vmem:[%s3748_s0 + $0x18] sm:$0xff] }
 0x123   :  { %2482 = vmatprep.mubr.msk.f32.mxu0 %vm80_vm1, %v55_v49 }
 0x124   :  { %3119 = vrcp.f32 %v244_v50  ;;  %v54_v50 = vld [vmem:[%s3748_s0 + $0x10] sm:$0xff] }
 0x125   :  { %161 = vmatmul.mubr.f32.gmra.mrb[2].mxu0 %v54_v50 }
 0x126   :  { %2712 = vmatprep.mubr.msk.f32.mxu0 %vm3274_vm0, %v3275_v1 }
 0x12e   :  { %v3120_v51 = vpop.eup %3119 }
 0x12f   :  { %v248_v54 = vmul.f32 0.0, %v3120_v51 }
 0x192   :  { %v251_v52 = vpop.permute.xlu0 %250 }
 0x193   :  { %v253_v53 = vmul.f32 %v3120_v51, %v251_v52 }
 0x195   :  { %255 = vrot.lane.b32.xlu0 %v253_v53, %s3278_s25 }
 0x1f8   :  { %v3500_v58 = vpop.f32.mrb[2].mxu0 }
 0x1f9   :  { %v164_v59 = vpop.f32.mrb[3].mxu0 }
 0x207   :  { %v256_v55 = vpop.permute.xlu0 %255 }
 0x208   :  { %v3382_v56 = vadd.f32 %v256_v55, %v248_v54 }
 0x20a   :  { %3121 = vtanh.f32 %v3382_v56  ;;  %v521_v41 = vrot.slane %v3382_v56, 6 }
 0x214   :  { %v3122_v7 = vpop.eup %3121 }
 0x215   :  { %261 = vrot.lane.b32.xlu1 %v3122_v7, %s3277_s24 }
 0x287   :  { %v262_v8 = vpop.permute.xlu1 %261 }
 0x288   :  { %v264_v9 = vmul.f32 %v3120_v51, %v262_v8 }
 0x28a   :  { %336 = vrot.lane.b32.xlu1 %v264_v9, %s3278_s25 }
 0x2fc   :  { %v337_v12 = vpop.permute.xlu1 %336 }
 0x2fd   :  { %2680 = vmatmul.mubr.msk.f32.vlgmr.msra.gmra.mrb[4].mxu1 %vm166_vm5, %v337_v12 }
 0x2fe   :  { %2975 = vmatpush3.bf16.msra.mxu1 %v3338_v13  ;;  %2690 = vmatprep.mubr.msk.f32.mxu1 %vm3274_vm0, %v3275_v1 }
 0x2ff   :  { %2976 = vmatprep.subr.bf16.mxu1 %v3273_v0 }
 0x302   :  { %2978 = vmatpush3.bf16.msra.mxu1 %v3351_v19 }
 0x303   :  { %2979 = vmatprep.subr.bf16.mxu1 %v3273_v0 }
 0x305   :  { %2691 = vmatmul.mubr.msk.f32.vlgmr.msra.gmra.mrb[6].mxu1 %vm166_vm5, %v337_v12 }
 0x306   :  { %2981 = vmatpush3.bf16.msra.mxu1 %v3394_v60  ;;  %2701 = vmatprep.mubr.msk.f32.mxu1 %vm3274_vm0, %v3275_v1 }
 0x307   :  { %2982 = vmatprep.subr.bf16.mxu1 %v3273_v0 }
 0x30a   :  { %2984 = vmatpush3.bf16.msra.mxu1 %v3408_v3 }
 0x30b   :  { %2991 = vmatprep.subr.bf16.mxu1 %v3273_v0 }
 0x3d0   :  { %v406_v15 = vpop.f32.mrb[4].mxu1 }
 0x3d1   :  { %v407_v16 = vadd.f32 %v406_v15, %v331_v10  ;;  %v2681_v17 = vpop.f32.mrb[5].mxu1 }
 0x3d3   :  { %v414_v18 = vadd.f32 %v3451_v14, %v407_v16 }
 0x3d5   :  { %3123 = vtanh.f32 %v414_v18  ;;  %v2486_v26 = vmul.f32 -1.442695, %v414_v18 }
 0x3d8   :  { %v505_v20 = vpop.f32.mrb[6].mxu1 }
 0x3d9   :  { %v510_v21 = vrot.slane %v505_v20, 6  ;;  %v2692_v22 = vpop.f32.mrb[7].mxu1 }
 0x3db   :  { %v512_v23 = vadd.f32 %v510_v21, %v3377_v44 }
 0x3dd   :  { %3125 = vtanh.f32 %v512_v23  ;;  %v2488_v27 = vmul.f32 -1.442695, %v512_v23 }
 0x3de   :  { %3127 = vpow2.f32 %v2486_v26 }
 0x3df   :  { %v3124_v24 = vpop.eup %3123  ;;  %3129 = vpow2.f32 %v2488_v27 }
 0x3e0   :  { %424 = vrot.lane.b32.xlu0 %v3124_v24, %s3277_s24 }
 0x3e7   :  { %v3126_v25 = vpop.eup %3125 }
 0x3e8   :  { %525 = vrot.lane.b32.xlu1 %v3126_v25, %s3277_s24  ;;  %v3128_v28 = vpop.eup %3127 }
 0x3e9   :  { %v418_v29 = vadd.f32 1.0, %v3128_v28  ;;  %v3130_v30 = vpop.eup %3129 }
 0x3ea   :  { %v516_v31 = vadd.f32 1.0, %v3130_v30 }
 0x3eb   :  { %3131 = vrcp.f32 %v418_v29 }
 0x3ec   :  { %3133 = vrcp.f32 %v516_v31 }
 0x3f5   :  { %v3132_v32 = vpop.eup %3131 }
 0x3f6   :  { %v3134_v35 = vpop.eup %3133  ;;  %v422_v38 = vmul.f32 0.0, %v3132_v32 }
 0x3f7   :  { %v523_v43 = vmul.f32 %v3134_v35, %v521_v41 }
 0x452   :  { %v425_v33 = vpop.permute.xlu0 %424 }
 0x453   :  { %v427_v34 = vmul.f32 %v3132_v32, %v425_v33 }
 0x455   :  { %429 = vrot.lane.b32.xlu0 %v427_v34, %s3278_s25 }
 0x45a   :  { %v526_v36 = vpop.permute.xlu1 %525 }
 0x45b   :  { %v528_v37 = vmul.f32 %v3134_v35, %v526_v36 }
 0x45d   :  { %530 = vrot.lane.b32.xlu1 %v528_v37, %s3278_s25 }
 0x4c7   :  { %v430_v39 = vpop.permute.xlu0 %429 }
 0x4c8   :  { %v3459_v40 = vadd.f32 %v430_v39, %v422_v38 }
 0x4ca   :  { %3135 = vtanh.f32 %v3459_v40 }
 0x4cf   :  { %v531_v45 = vpop.permute.xlu1 %530 }
 0x4d0   :  { %v3463_v46 = vadd.f32 %v531_v45, %v523_v43 }
 0x4d2   :  { %3137 = vtanh.f32 %v3463_v46  ;;  %v798_v29 = vrot.slane %v3463_v46, 6 }
 0x4d4   :  { %v3136_v47 = vpop.eup %3135 }
 0x4d5   :  { %435 = vrot.lane.b32.xlu0 %v3136_v47, %s3277_s24 }
 0x4dc   :  { %v3138_v48 = vpop.eup %3137 }
 0x4dd   :  { %536 = vrot.lane.b32.xlu1 %v3138_v48, %s3277_s24 }
 0x547   :  { %v436_v51 = vpop.permute.xlu0 %435 }
 0x548   :  { %v438_v52 = vmul.f32 %v3132_v32, %v436_v51 }
 0x54a   :  { %541 = vrot.lane.b32.xlu0 %v438_v52, %s3278_s25 }
 0x54f   :  { %v537_v53 = vpop.permute.xlu1 %536 }
 0x550   :  { %v539_v54 = vmul.f32 %v3134_v35, %v537_v53 }
 0x552   :  { %v616_v55 = vrot.slane %v539_v54, 2 }
 0x554   :  { %617 = vrot.lane.b32.xlu1 %v616_v55, %s3278_s25 }
 0x5bc   :  { %v542_v56 = vpop.permute.xlu0 %541 }
 0x5bd   :  { %2702 = vmatmul.mubr.msk.f32.vlgmr.msra.gmra.mrb[8].mxu1 %vm166_vm5, %v542_v56 }
 0x5be   :  { %2993 = vmatpush3.bf16.msra.mxu1 %v3338_v13  ;;  %2723 = vmatprep.mubr.msk.f32.mxu1 %vm3274_vm0, %v3275_v1 }
 0x5bf   :  { %2994 = vmatprep.subr.bf16.mxu1 %v3273_v0 }
 0x5c2   :  { %2996 = vmatpush3.bf16.msra.mxu1 %v3351_v19 }
 0x5c3   :  { %3003 = vmatprep.subr.bf16.mxu1 %v3273_v0 }
 0x5c6   :  { %v618_v57 = vpop.permute.xlu1 %617 }
 0x5c7   :  { %2713 = vmatmul.mubr.msk.f32.vlgmr.msra.gmra.mrb[4].mxu0 %vm166_vm5, %v618_v57  ;;  %2724 = vmatmul.mubr.msk.f32.vlgmr.msra.gmra.mrb[10].mxu1 %vm166_vm5, %v618_v57 }
 0x5c8   :  { %2999 = vmatpush3.bf16.msra.mxu0 %v3394_v60  ;;  %3005 = vmatpush3.bf16.msra.mxu1 %v3405_v2 }
 0x5c9   :  { %3000 = vmatprep.subr.bf16.mxu0 %v3273_v0  ;;  %3006 = vmatprep.subr.bf16.mxu1 %v3273_v0 }
 0x5ca   :  { %2734 = vmatprep.mubr.msk.f32.mxu0 %vm3274_vm0, %v3275_v1  ;;  %2745 = vmatprep.mubr.msk.f32.mxu1 %vm3274_vm0, %v3275_v1 }
 0x5cc   :  { %3002 = vmatpush3.bf16.msra.mxu0 %v3408_v3  ;;  %3008 = vmatpush3.bf16.msra.mxu1 %v3419_v6 }
 0x5cd   :  { %3009 = vmatprep.subr.bf16.mxu0 %v3273_v0  ;;  %3015 = vmatprep.subr.bf16.mxu1 %v3273_v0 }
 0x690   :  { %v611_v61 = vpop.f32.mrb[8].mxu1 }
 0x691   :  { %v2703_v62 = vpop.f32.mrb[9].mxu1 }
 0x69a   :  { %v687_v63 = vpop.f32.mrb[4].mxu0  ;;  %v782_v4 = vpop.f32.mrb[10].mxu1 }
 0x69b   :  { %v688_v5 = vadd.f32 %v687_v63, %v611_v61  ;;  %v787_v7 = vrot.slane %v782_v4, 4  ;;  %v2714_v8 = vpop.f32.mrb[5].mxu0  ;;  %v2725_v9 = vpop.f32.mrb[11].mxu1 }
 0x69d   :  { %v691_v10 = vadd.f32 %v3451_v14, %v688_v5  ;;  %v789_v11 = vadd.f32 %v787_v7, %v3377_v44 }
 0x69f   :  { %3139 = vtanh.f32 %v691_v10  ;;  %v2491_v16 = vmul.f32 -1.442695, %v691_v10  ;;  %v2493_v17 = vmul.f32 -1.442695, %v789_v11 }
 0x6a0   :  { %3141 = vtanh.f32 %v789_v11 }
 0x6a1   :  { %3143 = vpow2.f32 %v2491_v16 }
 0x6a2   :  { %3145 = vpow2.f32 %v2493_v17 }
 0x6a9   :  { %v3140_v12 = vpop.eup %3139 }
 0x6aa   :  { %v3142_v15 = vpop.eup %3141  ;;  %701 = vrot.lane.b32.xlu0 %v3140_v12, %s3277_s24 }
 0x6ab   :  { %802 = vrot.lane.b32.xlu1 %v3142_v15, %s3277_s24  ;;  %v3144_v18 = vpop.eup %3143 }
 0x6ac   :  { %v3146_v20 = vpop.eup %3145  ;;  %v695_v21 = vadd.f32 1.0, %v3144_v18 }
 0x6ad   :  { %v793_v22 = vadd.f32 1.0, %v3146_v20 }
 0x6ae   :  { %3147 = vrcp.f32 %v695_v21 }
 0x6af   :  { %3149 = vrcp.f32 %v793_v22 }
 0x6b8   :  { %v3148_v23 = vpop.eup %3147 }
 0x6b9   :  { %v3150_v25 = vpop.eup %3149  ;;  %v699_v30 = vmul.f32 %v3148_v23, %v3459_v40 }
 0x6ba   :  { %v800_v32 = vmul.f32 %v3150_v25, %v798_v29 }
 0x71c   :  { %v702_v24 = vpop.permute.xlu0 %701 }
 0x71d   :  { %v704_v26 = vmul.f32 %v3148_v23, %v702_v24  ;;  %v803_v27 = vpop.permute.xlu1 %802 }
 0x71e   :  { %v805_v28 = vmul.f32 %v3150_v25, %v803_v27 }
 0x71f   :  { %706 = vrot.lane.b32.xlu0 %v704_v26, %s3278_s25 }
 0x720   :  { %807 = vrot.lane.b32.xlu1 %v805_v28, %s3278_s25 }
 0x791   :  { %v707_v31 = vpop.permute.xlu0 %706 }
 0x792   :  { %v3510_v33 = vadd.f32 %v707_v31, %v699_v30  ;;  %v808_v34 = vpop.permute.xlu1 %807 }
 0x793   :  { %v3512_v35 = vadd.f32 %v808_v34, %v800_v32  ;;  %v3582_v34 = vadd.f32 %v3374_v42, %v3500_v58 }
 0x794   :  { %3151 = vtanh.f32 %v3510_v33 }
 0x795   :  { %3153 = vtanh.f32 %v3512_v35  ;;  %v1075_v18 = vrot.slane %v3512_v35, 6 }
 0x79e   :  { %v3152_v36 = vpop.eup %3151 }
 0x79f   :  { %v3154_v37 = vpop.eup %3153  ;;  %712 = vrot.lane.b32.xlu0 %v3152_v36, %s3277_s24 }
 0x7a0   :  { %813 = vrot.lane.b32.xlu1 %v3154_v37, %s3277_s24 }
 0x811   :  { %v713_v38 = vpop.permute.xlu0 %712 }
 0x812   :  { %v715_v39 = vmul.f32 %v3148_v23, %v713_v38  ;;  %v814_v40 = vpop.permute.xlu1 %813 }
 0x813   :  { %v816_v41 = vmul.f32 %v3150_v25, %v814_v40 }
 0x814   :  { %818 = vrot.lane.b32.xlu0 %v715_v39, %s3278_s25 }
 0x815   :  { %v893_v43 = vrot.slane %v816_v41, 4 }
 0x817   :  { %894 = vrot.lane.b32.xlu1 %v893_v43, %s3278_s25 }
 0x886   :  { %v819_v45 = vpop.permute.xlu0 %818 }
 0x887   :  { %2735 = vmatmul.mubr.msk.f32.vlgmr.msra.gmra.mrb[6].mxu0 %vm166_vm5, %v819_v45 }
 0x888   :  { %3011 = vmatpush3.bf16.msra.mxu0 %v3338_v13  ;;  %2756 = vmatprep.mubr.msk.f32.mxu0 %vm3274_vm0, %v3275_v1 }
 0x889   :  { %v895_v46 = vpop.permute.xlu1 %894  ;;  %3012 = vmatprep.subr.bf16.mxu0 %v3273_v0 }
 0x88a   :  { %2746 = vmatmul.mubr.msk.f32.vlgmr.msra.gmra.mrb[12].mxu1 %vm166_vm5, %v895_v46 }
 0x88b   :  { %3017 = vmatpush3.bf16.msra.mxu1 %v3394_v60  ;;  %2767 = vmatprep.mubr.msk.f32.mxu1 %vm3274_vm0, %v3275_v1 }
 0x88c   :  { %3014 = vmatpush3.bf16.msra.mxu0 %v3351_v19  ;;  %3018 = vmatprep.subr.bf16.mxu1 %v3273_v0 }
 0x88d   :  { %3021 = vmatprep.subr.bf16.mxu0 %v3273_v0 }
 0x88f   :  { %2757 = vmatmul.mubr.msk.f32.vlgmr.msra.gmra.mrb[8].mxu0 %vm166_vm5, %v895_v46  ;;  %3020 = vmatpush3.bf16.msra.mxu1 %v3408_v3 }
 0x890   :  { %3027 = vmatprep.subr.bf16.mxu1 %v3273_v0  ;;  %3023 = vmatpush3.bf16.msra.mxu0 %v3405_v2 }
 0x891   :  { %3024 = vmatprep.subr.bf16.mxu0 %v3273_v0  ;;  %2778 = vmatprep.mubr.msk.f32.mxu0 %vm3274_vm0, %v3275_v1 }
 0x894   :  { %3026 = vmatpush3.bf16.msra.mxu0 %v3419_v6 }
 0x895   :  { %3033 = vmatprep.subr.bf16.mxu0 %v3273_v0 }
 0x95a   :  { %v888_v47 = vpop.f32.mrb[6].mxu0 }
 0x95b   :  { %v2736_v48 = vpop.f32.mrb[7].mxu0 }
 0x95d   :  { %v964_v49 = vpop.f32.mrb[12].mxu1 }
 0x95e   :  { %v965_v50 = vadd.f32 %v964_v49, %v888_v47  ;;  %v2747_v51 = vpop.f32.mrb[13].mxu1 }
 0x960   :  { %v968_v52 = vadd.f32 %v3451_v14, %v965_v50 }
 0x962   :  { %3155 = vtanh.f32 %v968_v52  ;;  %v1059_v53 = vpop.f32.mrb[8].mxu0  ;;  %v2496_v61 = vmul.f32 -1.442695, %v968_v52 }
 0x963   :  { %v1064_v54 = vrot.slane %v1059_v53, 2  ;;  %v2758_v55 = vpop.f32.mrb[9].mxu0 }
 0x965   :  { %v1066_v56 = vadd.f32 %v1064_v54, %v3377_v44 }
 0x967   :  { %3157 = vtanh.f32 %v1066_v56  ;;  %v2498_v62 = vmul.f32 -1.442695, %v1066_v56 }
 0x968   :  { %3159 = vpow2.f32 %v2496_v61 }
 0x969   :  { %3161 = vpow2.f32 %v2498_v62 }
 0x96c   :  { %v3156_v57 = vpop.eup %3155 }
 0x96d   :  { %978 = vrot.lane.b32.xlu1 %v3156_v57, %s3277_s24 }
 0x971   :  { %v3158_v59 = vpop.eup %3157 }
 0x972   :  { %1079 = vrot.lane.b32.xlu0 %v3158_v59, %s3277_s24  ;;  %v3160_v63 = vpop.eup %3159 }
 0x973   :  { %v972_v4 = vadd.f32 1.0, %v3160_v63  ;;  %v3162_v5 = vpop.eup %3161 }
 0x974   :  { %v1070_v7 = vadd.f32 1.0, %v3162_v5 }
 0x975   :  { %3163 = vrcp.f32 %v972_v4 }
 0x976   :  { %3165 = vrcp.f32 %v1070_v7 }
 0x97f   :  { %v3164_v8 = vpop.eup %3163 }
 0x980   :  { %v3166_v10 = vpop.eup %3165  ;;  %v976_v15 = vmul.f32 %v3164_v8, %v3510_v33 }
 0x981   :  { %v1077_v20 = vmul.f32 %v3166_v10, %v1075_v18 }
 0x9df   :  { %v979_v9 = vpop.permute.xlu1 %978 }
 0x9e0   :  { %v981_v44 = vmul.f32 %v3164_v8, %v979_v9 }
 0x9e2   :  { %983 = vrot.lane.b32.xlu1 %v981_v44, %s3278_s25 }
 0x9e4   :  { %v1080_v11 = vpop.permute.xlu0 %1079 }
 0x9e5   :  { %v1082_v12 = vmul.f32 %v3166_v10, %v1080_v11 }
 0x9e7   :  { %1084 = vrot.lane.b32.xlu0 %v1082_v12, %s3278_s25 }
 0xa54   :  { %v984_v16 = vpop.permute.xlu1 %983 }
 0xa55   :  { %v3548_v17 = vadd.f32 %v984_v16, %v976_v15 }
 0xa57   :  { %3167 = vtanh.f32 %v3548_v17 }
 0xa59   :  { %v1085_v21 = vpop.permute.xlu0 %1084 }
 0xa5a   :  { %v3552_v22 = vadd.f32 %v1085_v21, %v1077_v20 }
 0xa5c   :  { %3169 = vtanh.f32 %v3552_v22  ;;  %v1349_v56 = vrot.slane %v3552_v22, 6 }
 0xa61   :  { %v3168_v23 = vpop.eup %3167 }
 0xa62   :  { %989 = vrot.lane.b32.xlu1 %v3168_v23, %s3277_s24 }
 0xa66   :  { %v3170_v24 = vpop.eup %3169 }
 0xa67   :  { %1090 = vrot.lane.b32.xlu0 %v3170_v24, %s3277_s24 }
 0xad4   :  { %v990_v25 = vpop.permute.xlu1 %989 }
 0xad5   :  { %v992_v26 = vmul.f32 %v3164_v8, %v990_v25 }
 0xad7   :  { %1095 = vrot.lane.b32.xlu0 %v992_v26, %s3278_s25 }
 0xad9   :  { %v1091_v27 = vpop.permute.xlu0 %1090 }
 0xada   :  { %v1093_v28 = vmul.f32 %v3166_v10, %v1091_v27 }
 0xadc   :  { %v1170_v29 = vrot.slane %v1093_v28, 6 }
 0xade   :  { %1171 = vrot.lane.b32.xlu1 %v1170_v29, %s3278_s25 }
 0xb49   :  { %v1096_v30 = vpop.permute.xlu0 %1095 }
 0xb4a   :  { %2768 = vmatmul.mubr.msk.f32.vlgmr.msra.gmra.mrb[14].mxu1 %vm166_vm5, %v1096_v30 }
 0xb4b   :  { %3029 = vmatpush3.bf16.msra.mxu1 %v3338_v13  ;;  %2789 = vmatprep.mubr.msk.f32.mxu1 %vm3274_vm0, %v3275_v1 }
 0xb4c   :  { %3030 = vmatprep.subr.bf16.mxu1 %v3273_v0 }
 0xb4f   :  { %3032 = vmatpush3.bf16.msra.mxu1 %v3351_v19 }
 0xb50   :  { %v1172_v31 = vpop.permute.xlu1 %1171  ;;  %3039 = vmatprep.subr.bf16.mxu1 %v3273_v0 }
 0xb51   :  { %2779 = vmatmul.mubr.msk.f32.vlgmr.msra.gmra.mrb[10].mxu0 %vm166_vm5, %v1172_v31 }
 0xb52   :  { %2790 = vmatmul.mubr.msk.f32.vlgmr.msra.gmra.mrb[16].mxu1 %vm166_vm5, %v1172_v31  ;;  %3035 = vmatpush3.bf16.msra.mxu0 %v3394_v60 }
 0xb53   :  { %3041 = vmatpush3.bf16.msra.mxu1 %v3405_v2  ;;  %3036 = vmatprep.subr.bf16.mxu0 %v3273_v0 }
 0xb54   :  { %3042 = vmatprep.subr.bf16.mxu1 %v3273_v0  ;;  %2811 = vmatprep.mubr.msk.f32.mxu1 %vm3274_vm0, %v3275_v1 }
 0xb55   :  { %2800 = vmatprep.mubr.msk.f32.mxu0 %vm3274_vm0, %v3275_v1 }
 0xb56   :  { %3038 = vmatpush3.bf16.msra.mxu0 %v3408_v3 }
 0xb57   :  { %3044 = vmatpush3.bf16.msra.mxu1 %v3419_v6  ;;  %3045 = vmatprep.subr.bf16.mxu0 %v3273_v0 }
 0xb58   :  { %3051 = vmatprep.subr.bf16.mxu1 %v3273_v0 }
 0xc1d   :  { %v1165_v32 = vpop.f32.mrb[14].mxu1 }
 0xc1e   :  { %v2769_v33 = vpop.f32.mrb[15].mxu1 }
 0xc24   :  { %v1241_v35 = vpop.f32.mrb[10].mxu0 }
 0xc25   :  { %v1242_v36 = vadd.f32 %v1241_v35, %v1165_v32  ;;  %v1336_v37 = vpop.f32.mrb[16].mxu1  ;;  %v2780_v38 = vpop.f32.mrb[11].mxu0 }
 0xc26   :  { %v1340_v39 = vadd.f32 %v1336_v37, %v3582_v34  ;;  %v2791_v40 = vpop.f32.mrb[17].mxu1 }
 0xc27   :  { %v1245_v41 = vadd.f32 %v3451_v14, %v1242_v36 }
 0xc28   :  { %3171 = vtanh.f32 %v1340_v39  ;;  %v2503_v46 = vmul.f32 -1.442695, %v1340_v39 }
 0xc29   :  { %3173 = vtanh.f32 %v1245_v41  ;;  %v2501_v42 = vmul.f32 -1.442695, %v1245_v41 }
 0xc2a   :  { %3175 = vpow2.f32 %v2503_v46 }
 0xc2b   :  { %3177 = vpow2.f32 %v2501_v42 }
 0xc32   :  { %v3172_v43 = vpop.eup %3171 }
 0xc33   :  { %v3174_v45 = vpop.eup %3173  ;;  %1353 = vrot.lane.b32.xlu1 %v3172_v43, %s3277_s24 }
 0xc34   :  { %1255 = vrot.lane.b32.xlu0 %v3174_v45, %s3277_s24  ;;  %v3176_v58 = vpop.eup %3175 }
 0xc35   :  { %v3178_v47 = vpop.eup %3177  ;;  %v1344_v48 = vadd.f32 1.0, %v3176_v58 }
 0xc36   :  { %v1249_v49 = vadd.f32 1.0, %v3178_v47 }
 0xc37   :  { %3179 = vrcp.f32 %v1344_v48 }
 0xc38   :  { %3181 = vrcp.f32 %v1249_v49 }
 0xc41   :  { %v3180_v50 = vpop.eup %3179 }
 0xc42   :  { %v3182_v52 = vpop.eup %3181  ;;  %v1351_v57 = vmul.f32 %v3180_v50, %v1349_v56 }
 0xc43   :  { %v1253_v61 = vmul.f32 %v3182_v52, %v3548_v17 }
 0xca5   :  { %v1354_v51 = vpop.permute.xlu1 %1353 }
 0xca6   :  { %v1356_v53 = vmul.f32 %v3180_v50, %v1354_v51  ;;  %v1256_v54 = vpop.permute.xlu0 %1255 }
 0xca7   :  { %v1258_v55 = vmul.f32 %v3182_v52, %v1256_v54 }
 0xca8   :  { %1358 = vrot.lane.b32.xlu1 %v1356_v53, %s3278_s25 }
 0xca9   :  { %1260 = vrot.lane.b32.xlu0 %v1258_v55, %s3278_s25 }
 0xd1a   :  { %v1359_v59 = vpop.permute.xlu1 %1358 }
 0xd1b   :  { %v3592_v62 = vadd.f32 %v1359_v59, %v1351_v57  ;;  %v1261_v63 = vpop.permute.xlu0 %1260 }
 0xd1c   :  { %v3594_v4 = vadd.f32 %v1261_v63, %v1253_v61 }
 0xd1d   :  { %3183 = vtanh.f32 %v3592_v62  ;;  %v1625_v46 = vrot.slane %v3592_v62, 6 }
 0xd1e   :  { %3185 = vtanh.f32 %v3594_v4 }
 0xd27   :  { %v3184_v5 = vpop.eup %3183 }
 0xd28   :  { %v3186_v7 = vpop.eup %3185  ;;  %1364 = vrot.lane.b32.xlu1 %v3184_v5, %s3277_s24 }
 0xd29   :  { %1266 = vrot.lane.b32.xlu0 %v3186_v7, %s3277_s24 }
 0xd9a   :  { %v1365_v8 = vpop.permute.xlu1 %1364 }
 0xd9b   :  { %v1367_v9 = vmul.f32 %v3180_v50, %v1365_v8  ;;  %v1267_v44 = vpop.permute.xlu0 %1266 }
 0xd9c   :  { %v1269_v10 = vmul.f32 %v3182_v52, %v1267_v44 }
 0xd9d   :  { %1444 = vrot.lane.b32.xlu1 %v1367_v9, %s3278_s25 }
 0xd9e   :  { %1369 = vrot.lane.b32.xlu0 %v1269_v10, %s3278_s25 }
 0xe0f   :  { %v1445_v11 = vpop.permute.xlu1 %1444 }
 0xe10   :  { %2812 = vmatmul.mubr.msk.f32.vlgmr.msra.gmra.mrb[18].mxu1 %vm166_vm5, %v1445_v11  ;;  %v1370_v12 = vpop.permute.xlu0 %1369 }
 0xe11   :  { %2801 = vmatmul.mubr.msk.f32.vlgmr.msra.gmra.mrb[12].mxu0 %vm166_vm5, %v1370_v12  ;;  %3053 = vmatpush3.bf16.msra.mxu1 %v3394_v60 }
 0xe12   :  { %3047 = vmatpush3.bf16.msra.mxu0 %v3338_v13  ;;  %2822 = vmatprep.mubr.msk.f32.mxu0 %vm3274_vm0, %v3275_v1 }
 0xe13   :  { %3048 = vmatprep.subr.bf16.mxu0 %v3273_v0  ;;  %3054 = vmatprep.subr.bf16.mxu1 %v3273_v0 }
 0xe14   :  { %2833 = vmatprep.mubr.msk.f32.mxu1 %vm3274_vm0, %v3275_v1 }
 0xe15   :  { %3056 = vmatpush3.bf16.msra.mxu1 %v3408_v3 }
 0xe16   :  { %3050 = vmatpush3.bf16.msra.mxu0 %v3351_v19  ;;  %3063 = vmatprep.subr.bf16.mxu1 %v3273_v0 }
 0xe17   :  { %3057 = vmatprep.subr.bf16.mxu0 %v3273_v0 }
 0xe19   :  { %2823 = vmatmul.mubr.msk.f32.vlgmr.msra.gmra.mrb[14].mxu0 %vm166_vm5, %v1445_v11 }
 0xe1a   :  { %3059 = vmatpush3.bf16.msra.mxu0 %v3405_v2  ;;  %2844 = vmatprep.mubr.msk.f32.mxu0 %vm3274_vm0, %v3275_v1 }
 0xe1b   :  { %3060 = vmatprep.subr.bf16.mxu0 %v3273_v0 }
 0xe1e   :  { %3062 = vmatpush3.bf16.msra.mxu0 %v3419_v6 }
 0xe1f   :  { %3069 = vmatprep.subr.bf16.mxu0 %v3273_v0 }
 0xee3   :  { %v1514_v15 = vpop.f32.mrb[18].mxu1 }
 0xee4   :  { %v2813_v16 = vpop.f32.mrb[19].mxu1  ;;  %v1439_v17 = vpop.f32.mrb[12].mxu0 }
 0xee5   :  { %v1515_v18 = vadd.f32 %v1514_v15, %v1439_v17  ;;  %v2802_v20 = vpop.f32.mrb[13].mxu0 }
 0xee7   :  { %v1518_v21 = vadd.f32 %v3451_v14, %v1515_v18 }
 0xee9   :  { %3187 = vtanh.f32 %v1518_v21  ;;  %v2506_v28 = vmul.f32 -1.442695, %v1518_v21 }
 0xeec   :  { %v1609_v22 = vpop.f32.mrb[14].mxu0 }
 0xeed   :  { %v1614_v23 = vrot.slane %v1609_v22, 6  ;;  %v2824_v24 = vpop.f32.mrb[15].mxu0 }
 0xeef   :  { %v1616_v25 = vadd.f32 %v1614_v23, %v3582_v34 }
 0xef1   :  { %3189 = vtanh.f32 %v1616_v25  ;;  %v2508_v29 = vmul.f32 -1.442695, %v1616_v25 }
 0xef2   :  { %3191 = vpow2.f32 %v2506_v28 }
 0xef3   :  { %v3188_v26 = vpop.eup %3187  ;;  %3193 = vpow2.f32 %v2508_v29 }
 0xef4   :  { %1528 = vrot.lane.b32.xlu0 %v3188_v26, %s3277_s24 }
 0xefb   :  { %v3190_v27 = vpop.eup %3189 }
 0xefc   :  { %1629 = vrot.lane.b32.xlu1 %v3190_v27, %s3277_s24  ;;  %v3192_v30 = vpop.eup %3191 }
 0xefd   :  { %v1522_v31 = vadd.f32 1.0, %v3192_v30  ;;  %v3194_v32 = vpop.eup %3193 }
 0xefe   :  { %v1620_v33 = vadd.f32 1.0, %v3194_v32 }
 0xeff   :  { %3195 = vrcp.f32 %v1522_v31 }
 0xf00   :  { %3197 = vrcp.f32 %v1620_v33 }
 0xf09   :  { %v3196_v35 = vpop.eup %3195 }
 0xf0a   :  { %v3198_v38 = vpop.eup %3197  ;;  %v1526_v41 = vmul.f32 %v3196_v35, %v3594_v4 }
 0xf0b   :  { %v1627_v42 = vmul.f32 %v3198_v38, %v1625_v46 }
 0xf66   :  { %v1529_v36 = vpop.permute.xlu0 %1528 }
 0xf67   :  { %v1531_v37 = vmul.f32 %v3196_v35, %v1529_v36 }
 0xf69   :  { %1533 = vrot.lane.b32.xlu0 %v1531_v37, %s3278_s25 }
 0xf6e   :  { %v1630_v39 = vpop.permute.xlu1 %1629 }
 0xf6f   :  { %v1632_v40 = vmul.f32 %v3198_v38, %v1630_v39 }
 0xf71   :  { %1634 = vrot.lane.b32.xlu1 %v1632_v40, %s3278_s25 }
 0xfdb   :  { %v1534_v43 = vpop.permute.xlu0 %1533 }
 0xfdc   :  { %v3630_v45 = vadd.f32 %v1534_v43, %v1526_v41 }
 0xfde   :  { %3199 = vtanh.f32 %v3630_v45 }
 0xfe3   :  { %v1635_v58 = vpop.permute.xlu1 %1634 }
 0xfe4   :  { %v3634_v47 = vadd.f32 %v1635_v58, %v1627_v42 }
 0xfe6   :  { %3201 = vtanh.f32 %v3634_v47  ;;  %v1902_v26 = vrot.slane %v3634_v47, 6 }
 0xfe8   :  { %v3200_v48 = vpop.eup %3199 }
 0xfe9   :  { %1539 = vrot.lane.b32.xlu0 %v3200_v48, %s3277_s24 }
 0xff0   :  { %v3202_v49 = vpop.eup %3201 }
 0xff1   :  { %1640 = vrot.lane.b32.xlu1 %v3202_v49, %s3277_s24 }
0x105b   :  { %v1540_v50 = vpop.permute.xlu0 %1539 }
0x105c   :  { %v1542_v51 = vmul.f32 %v3196_v35, %v1540_v50 }
0x105e   :  { %1645 = vrot.lane.b32.xlu0 %v1542_v51, %s3278_s25 }
0x1063   :  { %v1641_v52 = vpop.permute.xlu1 %1640 }
0x1064   :  { %v1643_v53 = vmul.f32 %v3198_v38, %v1641_v52 }
0x1066   :  { %v1720_v54 = vrot.slane %v1643_v53, 2 }
0x1068   :  { %1721 = vrot.lane.b32.xlu1 %v1720_v54, %s3278_s25 }
0x10d0   :  { %v1646_v55 = vpop.permute.xlu0 %1645 }
0x10d1   :  { %2834 = vmatmul.mubr.msk.f32.vlgmr.msra.gmra.mrb[20].mxu1 %vm166_vm5, %v1646_v55 }
0x10d2   :  { %3065 = vmatpush3.bf16.msra.mxu1 %v3338_v13  ;;  %2855 = vmatprep.mubr.msk.f32.mxu1 %vm3274_vm0, %v3275_v1 }
0x10d3   :  { %3066 = vmatprep.subr.bf16.mxu1 %v3273_v0 }
0x10d6   :  { %3068 = vmatpush3.bf16.msra.mxu1 %v3351_v19 }
0x10d7   :  { %3075 = vmatprep.subr.bf16.mxu1 %v3273_v0 }
0x10da   :  { %v1722_v56 = vpop.permute.xlu1 %1721 }
0x10db   :  { %2845 = vmatmul.mubr.msk.f32.vlgmr.msra.gmra.mrb[16].mxu0 %vm166_vm5, %v1722_v56  ;;  %2856 = vmatmul.mubr.msk.f32.vlgmr.msra.gmra.mrb[22].mxu1 %vm166_vm5, %v1722_v56 }
0x10dc   :  { %3071 = vmatpush3.bf16.msra.mxu0 %v3394_v60  ;;  %3077 = vmatpush3.bf16.msra.mxu1 %v3405_v2 }
0x10dd   :  { %3072 = vmatprep.subr.bf16.mxu0 %v3273_v0  ;;  %3078 = vmatprep.subr.bf16.mxu1 %v3273_v0 }
0x10de   :  { %2866 = vmatprep.mubr.msk.f32.mxu0 %vm3274_vm0, %v3275_v1  ;;  %2877 = vmatprep.mubr.msk.f32.mxu1 %vm3274_vm0, %v3275_v1 }
0x10e0   :  { %3074 = vmatpush3.bf16.msra.mxu0 %v3408_v3  ;;  %3080 = vmatpush3.bf16.msra.mxu1 %v3419_v6 }
0x10e1   :  { %3081 = vmatprep.subr.bf16.mxu0 %v3273_v0  ;;  %3087 = vmatprep.subr.bf16.mxu1 %v3273_v0 }
0x11a4   :  { %v1715_v57 = vpop.f32.mrb[20].mxu1 }
0x11a5   :  { %v2835_v59 = vpop.f32.mrb[21].mxu1 }
0x11ae   :  { %v1791_v61 = vpop.f32.mrb[16].mxu0  ;;  %v1886_v62 = vpop.f32.mrb[22].mxu1 }
0x11af   :  { %v1792_v63 = vadd.f32 %v1791_v61, %v1715_v57  ;;  %v1891_v4 = vrot.slane %v1886_v62, 4  ;;  %v2846_v5 = vpop.f32.mrb[17].mxu0  ;;  %v2857_v7 = vpop.f32.mrb[23].mxu1 }
0x11b1   :  { %v1795_v8 = vadd.f32 %v3451_v14, %v1792_v63  ;;  %v1893_v9 = vadd.f32 %v1891_v4, %v3582_v34 }
0x11b3   :  { %3203 = vtanh.f32 %v1795_v8  ;;  %v2511_v11 = vmul.f32 -1.442695, %v1795_v8  ;;  %v2513_v12 = vmul.f32 -1.442695, %v1893_v9 }
0x11b4   :  { %3205 = vtanh.f32 %v1893_v9 }
0x11b5   :  { %3207 = vpow2.f32 %v2511_v11 }
0x11b6   :  { %3209 = vpow2.f32 %v2513_v12 }
0x11bd   :  { %v3204_v44 = vpop.eup %3203 }
0x11be   :  { %v3206_v10 = vpop.eup %3205  ;;  %1805 = vrot.lane.b32.xlu0 %v3204_v44, %s3277_s24 }
0x11bf   :  { %1906 = vrot.lane.b32.xlu1 %v3206_v10, %s3277_s24  ;;  %v3208_v15 = vpop.eup %3207 }
0x11c0   :  { %v3210_v16 = vpop.eup %3209  ;;  %v1799_v17 = vadd.f32 1.0, %v3208_v15 }
0x11c1   :  { %v1897_v18 = vadd.f32 1.0, %v3210_v16 }
0x11c2   :  { %3211 = vrcp.f32 %v1799_v17 }
0x11c3   :  { %3213 = vrcp.f32 %v1897_v18 }
0x11cc   :  { %v3212_v20 = vpop.eup %3211 }
0x11cd   :  { %v3214_v22 = vpop.eup %3213  ;;  %v1803_v27 = vmul.f32 %v3212_v20, %v3630_v45 }
0x11ce   :  { %v1904_v29 = vmul.f32 %v3214_v22, %v1902_v26 }
0x1230   :  { %v1806_v21 = vpop.permute.xlu0 %1805 }
0x1231   :  { %v1808_v23 = vmul.f32 %v3212_v20, %v1806_v21  ;;  %v1907_v24 = vpop.permute.xlu1 %1906 }
0x1232   :  { %v1909_v25 = vmul.f32 %v3214_v22, %v1907_v24 }
0x1233   :  { %1810 = vrot.lane.b32.xlu0 %v1808_v23, %s3278_s25 }
0x1234   :  { %1911 = vrot.lane.b32.xlu1 %v1909_v25, %s3278_s25  ;;  %v3245_v25 = vld [vmem:[%s3751_s3 + $0x1] ss:$0 sm:$0xff] }
0x12a5   :  { %v1811_v28 = vpop.permute.xlu0 %1810 }
0x12a6   :  { %v3670_v30 = vadd.f32 %v1811_v28, %v1803_v27  ;;  %v1912_v31 = vpop.permute.xlu1 %1911 }
0x12a7   :  { %v3672_v32 = vadd.f32 %v1912_v31, %v1904_v29 }
0x12a8   :  { %3215 = vtanh.f32 %v3670_v30 }
0x12a9   :  { %3217 = vtanh.f32 %v3672_v32  ;;  %v2179_v4 = vrot.slane %v3672_v32, 6 }
0x12b2   :  { %v3216_v33 = vpop.eup %3215 }
0x12b3   :  { %v3218_v35 = vpop.eup %3217  ;;  %1816 = vrot.lane.b32.xlu0 %v3216_v33, %s3277_s24 }
0x12b4   :  { %1917 = vrot.lane.b32.xlu1 %v3218_v35, %s3277_s24 }
0x1325   :  { %v1817_v36 = vpop.permute.xlu0 %1816 }
0x1326   :  { %v1819_v37 = vmul.f32 %v3212_v20, %v1817_v36  ;;  %v1918_v38 = vpop.permute.xlu1 %1917 }
0x1327   :  { %v1920_v39 = vmul.f32 %v3214_v22, %v1918_v38  ;;  %v2375_v38 = vld [vmem:[%s3752_s4 + $0x8] sm:$0xff] }
0x1328   :  { %1922 = vrot.lane.b32.xlu0 %v1819_v37, %s3278_s25  ;;  %v2374_v37 = vld [vmem:[%s3752_s4] sm:$0xff] }
0x1329   :  { %v1997_v40 = vrot.slane %v1920_v39, 4  ;;  %v2376_v39 = vld [vmem:[%s3752_s4 + $0x10] sm:$0xff] }
0x132b   :  { %1998 = vrot.lane.b32.xlu1 %v1997_v40, %s3278_s25  ;;  %v3100_v40 = vpack.c.bf16 %v2375_v38, %v2374_v37 }
0x139a   :  { %v1923_v41 = vpop.permute.xlu0 %1922 }
0x139b   :  { %2867 = vmatmul.mubr.msk.f32.vlgmr.msra.gmra.mrb[18].mxu0 %vm166_vm5, %v1923_v41  ;;  %v2377_v41 = vld [vmem:[%s3752_s4 + $0x18] sm:$0xff]  ;;  %s3279_s4 = smov 96  }
0x139c   :  { %3083 = vmatpush3.bf16.msra.mxu0 %v3338_v13  ;;  %2888 = vmatprep.mubr.msk.f32.mxu0 %vm3274_vm0, %v3275_v1 }
0x139d   :  { %v1999_v43 = vpop.permute.xlu1 %1998  ;;  %3084 = vmatprep.subr.bf16.mxu0 %v3273_v0 }
0x139e   :  { %2878 = vmatmul.mubr.msk.f32.vlgmr.msra.gmra.mrb[24].mxu1 %vm166_vm5, %v1999_v43 }
0x139f   :  { %3089 = vmatpush3.bf16.msra.mxu1 %v3394_v60  ;;  %2899 = vmatprep.mubr.msk.f32.mxu1 %vm3274_vm0, %v3275_v1 }
0x13a0   :  { %3086 = vmatpush3.bf16.msra.mxu0 %v3351_v19  ;;  %3090 = vmatprep.subr.bf16.mxu1 %v3273_v0 }
0x13a1   :  { %3093 = vmatprep.subr.bf16.mxu0 %v3273_v0 }
0x13a3   :  { %2889 = vmatmul.mubr.msk.f32.vlgmr.msra.gmra.mrb[20].mxu0 %vm166_vm5, %v1999_v43  ;;  %3092 = vmatpush3.bf16.msra.mxu1 %v3408_v3  ;;  %v3103_v43 = vpack.c.bf16 %v2377_v41, %v2376_v39 }
0x13a4   :  { %3095 = vmatpush3.bf16.msra.mxu0 %v3405_v2  ;;  %2910 = vmatprep.mubr.msk.f32.mxu0 %vm3274_vm0, %v3275_v1 }
0x13a5   :  { %3096 = vmatprep.subr.bf16.mxu0 %v3273_v0  ;;  %3099 = vmatprep.subr.bf16.mxu1 %v3273_v0 }
0x13a8   :  { %3098 = vmatpush3.bf16.msra.mxu0 %v3419_v6 }
0x146e   :  { %v1992_v13 = vpop.f32.mrb[18].mxu0 }
0x146f   :  { %v2868_v19 = vpop.f32.mrb[19].mxu0 }
0x1471   :  { %v2068_v60 = vpop.f32.mrb[24].mxu1 }
0x1472   :  { %v2069_v45 = vadd.f32 %v2068_v60, %v1992_v13  ;;  %v2879_v46 = vpop.f32.mrb[25].mxu1 }
0x1473   :  { %v2522_v46 = vld [vmem:[%s3751_s3 + $0x2] ss:$0 sm:$0xff] }
0x1474   :  { %v2072_v42 = vadd.f32 %v3451_v14, %v2069_v45 }
0x1476   :  { %3219 = vtanh.f32 %v2072_v42  ;;  %v2163_v3 = vpop.f32.mrb[20].mxu0  ;;  %v2516_v6 = vmul.f32 -1.442695, %v2072_v42 }
0x1477   :  { %v2168_v58 = vrot.slane %v2163_v3, 2  ;;  %v2890_v2 = vpop.f32.mrb[21].mxu0 }
0x1479   :  { %v2170_v47 = vadd.f32 %v2168_v58, %v3582_v34 }
0x147b   :  { %3221 = vtanh.f32 %v2170_v47  ;;  %v2518_v50 = vmul.f32 -1.442695, %v2170_v47 }
0x147c   :  { %3223 = vpow2.f32 %v2516_v6 }
0x147d   :  { %3225 = vpow2.f32 %v2518_v50 }
0x1480   :  { %v3220_v48 = vpop.eup %3219 }
0x1481   :  { %2082 = vrot.lane.b32.xlu1 %v3220_v48, %s3277_s24  ;;  %v2457_v48 = vld [vmem:[%s3753_s5] sm:$0x3] }
0x1485   :  { %v3222_v49 = vpop.eup %3221 }
0x1486   :  { %2183 = vrot.lane.b32.xlu0 %v3222_v49, %s3277_s24  ;;  %v3224_v51 = vpop.eup %3223 }
0x1487   :  { %v2076_v52 = vadd.f32 1.0, %v3224_v51  ;;  %v3226_v14 = vpop.eup %3225 }
0x1488   :  { %v2174_v53 = vadd.f32 1.0, %v3226_v14 }
0x1489   :  { %3227 = vrcp.f32 %v2076_v52 }
0x148a   :  { %3229 = vrcp.f32 %v2174_v53 }
0x1493   :  { %v3228_v54 = vpop.eup %3227 }
0x1494   :  { %v3230_v56 = vpop.eup %3229  ;;  %v2080_v61 = vmul.f32 %v3228_v54, %v3670_v30 }
0x1495   :  { %v2181_v5 = vmul.f32 %v3230_v56, %v2179_v4 }
0x14f3   :  { %v2083_v55 = vpop.permute.xlu1 %2082 }
0x14f4   :  { %v2085_v34 = vmul.f32 %v3228_v54, %v2083_v55 }
0x14f6   :  { %2087 = vrot.lane.b32.xlu1 %v2085_v34, %s3278_s25 }
0x14f8   :  { %v2184_v57 = vpop.permute.xlu0 %2183 }
0x14f9   :  { %v2186_v59 = vmul.f32 %v3230_v56, %v2184_v57 }
0x14fb   :  { %2188 = vrot.lane.b32.xlu0 %v2186_v59, %s3278_s25 }
0x1568   :  { %v2088_v62 = vpop.permute.xlu1 %2087 }
0x1569   :  { %v2090_v63 = vadd.f32 %v2088_v62, %v2080_v61 }
0x156b   :  { %3231 = vtanh.f32 %v2090_v63 }
0x156d   :  { %v2189_v7 = vpop.permute.xlu0 %2188 }
0x156e   :  { %v2191_v8 = vadd.f32 %v2189_v7, %v2181_v5 }
0x1570   :  { %3233 = vtanh.f32 %v2191_v8 }
0x1575   :  { %v3232_v9 = vpop.eup %3231 }
0x1576   :  { %2093 = vrot.lane.b32.xlu1 %v3232_v9, %s3277_s24 }
0x157a   :  { %v3234_v44 = vpop.eup %3233 }
0x157b   :  { %2194 = vrot.lane.b32.xlu0 %v3234_v44, %s3277_s24 }
0x15e8   :  { %v2094_v10 = vpop.permute.xlu1 %2093 }
0x15e9   :  { %v2096_v11 = vmul.f32 %v3228_v54, %v2094_v10 }
0x15eb   :  { %2199 = vrot.lane.b32.xlu0 %v2096_v11, %s3278_s25 }
0x15ed   :  { %v2195_v12 = vpop.permute.xlu0 %2194 }
0x15ee   :  { %v2197_v15 = vmul.f32 %v3230_v56, %v2195_v12 }
0x15f0   :  { %v2274_v16 = vrot.slane %v2197_v15, 6 }
0x15f2   :  { %2275 = vrot.lane.b32.xlu1 %v2274_v16, %s3278_s25 }
0x165d   :  { %v2200_v17 = vpop.permute.xlu0 %2199 }
0x165e   :  { %2900 = vmatmul.mubr.msk.f32.vlgmr.msra.gmra.mrb[26].mxu1 %vm166_vm5, %v2200_v17 }
0x165f   :  { %2921 = vmatprep.mubr.msk.f32.mxu1 %vm3274_vm0, %v3275_v1  ;;  %3101 = vmatpush3.bf16.msra.mxu1 %v3100_v40 }
0x1660   :  { %3102 = vmatprep.subr.bf16.mxu1 %v3273_v0 }
0x1663   :  { %3104 = vmatpush3.bf16.msra.mxu1 %v3103_v43 }
0x1664   :  { %v2276_v18 = vpop.permute.xlu1 %2275 }
0x1665   :  { %2911 = vmatmul.mubr.msk.f32.vlgmr.msra.gmra.mrb[22].mxu0 %vm166_vm5, %v2276_v18 }
0x1731   :  { %v2269_v20 = vpop.f32.mrb[26].mxu1 }
0x1732   :  { %v2901_v21 = vpop.f32.mrb[27].mxu1 }
0x1738   :  { %v2345_v22 = vpop.f32.mrb[22].mxu0 }
0x1739   :  { %v2346_v23 = vadd.f32 %v2345_v22, %v2269_v20  ;;  %v2912_v24 = vpop.f32.mrb[23].mxu0 }
0x173b   :  { %v2349_v26 = vadd.f32 %v3245_v25, %v2346_v23 }
0x173d   :  { %3235 = vtanh.f32 %v2349_v26  ;;  %v2521_v28 = vmul.f32 -1.442695, %v2349_v26 }
0x173f   :  { %3237 = vpow2.f32 %v2521_v28 }
0x1747   :  { %v3236_v27 = vpop.eup %3235 }
0x1748   :  { %2359 = vrot.lane.b32.xlu0 %v3236_v27, %s3277_s24 }
0x1749   :  { %v3238_v1 = vpop.eup %3237 }
0x174a   :  { %v2353_v29 = vadd.f32 1.0, %v3238_v1 }
0x174c   :  { %3239 = vrcp.f32 %v2353_v29 }
0x1756   :  { %v3240_v30 = vpop.eup %3239 }
0x1757   :  { %v2357_v33 = vmul.f32 %v3240_v30, %v2090_v63 }
0x17ba   :  { %v2360_v31 = vpop.permute.xlu0 %2359 }
0x17bb   :  { %v2362_v32 = vmul.f32 %v3240_v30, %v2360_v31 }
0x17bd   :  { %2364 = vrot.lane.b32.xlu1 %v2362_v32, %s3278_s25 }
0x182f   :  { %v2365_v35 = vpop.permute.xlu1 %2364 }
0x1830   :  { %v2367_v36 = vadd.f32 %v2365_v35, %v2357_v33 }
0x1832   :  { %3241 = vtanh.f32 %v2367_v36 }
0x183c   :  { %v3242_v13 = vpop.eup %3241 }
0x183d   :  { %2370 = vrot.lane.b32.xlu0 %v3242_v13, %s3277_s24 }
0x18af   :  { %v2371_v19 = vpop.permute.xlu0 %2370 }
0x18b0   :  { %v2373_v60 = vmul.f32 %v3240_v30, %v2371_v19 }
0x18b2   :  { %2383 = vrot.lane.b32.xlu1 %v2373_v60, %s3278_s25 }
0x1924   :  { %v2384_v45 = vpop.permute.xlu1 %2383 }
0x1925   :  { %2922 = vmatmul.mubr.msk.f32.vlgmr.msra.gmra.mrb[28].mxu1 %vm166_vm5, %v2384_v45 }
0x19f8   :  { %v2453_v42 = vpop.f32.mrb[28].mxu1 }
0x19f9   :  { %v2454_v3 = vadd.f32 %v2522_v46, %v2453_v42  ;;  %v2923_v58 = vpop.f32.mrb[29].mxu1 }
0x19fb   :  { %v2458_v2 = vmul.f32 0.5, %v2454_v3  ;;  %2468 = vrot.lane.b32.xlu1 %v2454_v3, %s3278_s25 }
0x19fd   :  { %v2459_v0 = vmul.f32 1.442695, %v2458_v2 }
0x19ff   :  { %3243 = vpow2.f32 %v2459_v0 }
0x1a09   :  { %v3244_v47 = vpop.eup %3243 }
0x1a0a   :  { %2462 = vrot.lane.b32.xlu0 %v3244_v47, %s3279_s4 }
0x1a6d   :  { %v2469_v51 = vpop.permute.xlu1 %2468 }
0x1a7c   :  { %v2463_v49 = vpop.permute.xlu0 %2462 }
0x1a7d   :  { %v2465_v6 = vmul.f32 %v2463_v49, %v2457_v48 }
0x1a7f   :  { %v2466_v50 = vadd.f32 %v2465_v6, %v2454_v3 }
0x1a81   :  { %v2471_v52 = vsel %vm166_vm5, %v2466_v50, %v2469_v51 }
0x1a82   :  { %2473 = vst.msk [vmem:[%s3754_s6] sm:$0x3] %vm2472_vm6, %v2471_v52 }
0x1a83   :  { %2478 = vsyncpa [#allocation3], 1 }

</bundles_post_ra>
